<compile_context>
chip_gen: v6e
topology: v6e:2x2x1
jax: 0.10.0
libtpu: 0.0.40
codegen_flags: <defaults>
</compile_context>

<pallas_src>
import jax
import jax.numpy as jnp
from jax.experimental import pallas as pl
from jax.experimental.pallas import tpu as pltpu


def _lstm_autoreg_kernel(x_ref, w_fold_ref, b_fold_ref,
                         w_hh0_ref, w_ih1_ref, w_hh1_ref, b1_ref,
                         w_out_ref, b_out_ref,
                         out_ref, hn_ref, cn_ref):
    """Whole forward pass in one kernel invocation (shapes are small).

    x_ref     : (T*Bp, F)   time-major rows: row t*Bp + b = x_pad[b, t, :]
    w_fold_ref: (F, 4H)     input Linear folded into layer-0 W_ih (i/f/o cols *0.5)
    b_fold_ref: (1, 4H)     (b_in @ W_ih0^T + b_ih0 + b_hh0) (i/f/o cols *0.5)
    w_hh0_ref : (H, 4H)     layer-0 recurrent weight (i/f/o cols *0.5)
    w_ih1_ref : (H, 4H)     layer-1 input-hidden weight (i/f/o cols *0.5)
    w_hh1_ref : (H, 4H)     layer-1 recurrent weight (i/f/o cols *0.5)
    b1_ref    : (1, 4H)     (b_ih1 + b_hh1) (i/f/o cols *0.5)
    w_out_ref : (T, H, OUT) output Linear split per timestep
    b_out_ref : (1, OUT)
    out_ref   : (Bp, OUT); hn_ref/cn_ref: (2, Bp, H)
    """
    H = w_hh0_ref.shape[0]
    B = out_ref.shape[0]
    T = x_ref.shape[0] // B
    OUT = out_ref.shape[1]

    # --- (1) all non-recurrent input work hoisted off the recurrence:
    #         layer-0 input gates for every timestep in ONE batched matmul.
    pre0 = (jnp.dot(x_ref[...], w_fold_ref[...],
                    preferred_element_type=jnp.float32)
            + b_fold_ref[...])                               # (T*Bp, 4H)

    def gates_to_hc(gates, c):
        # ONE full-width EUP push (tanh on the (Bp,4H) vreg); the i/f/o
        # sigmoids are recovered with pre-scaled-by-0.5 gates as
        # sigmoid(x) = 0.5*tanh(x/2) + 0.5 (plain VPU mul/add).
        tg = jnp.tanh(gates)
        i = 0.5 * tg[:, 0:H] + 0.5
        f = 0.5 * tg[:, H:2 * H] + 0.5
        g = tg[:, 2 * H:3 * H]
        o = 0.5 * tg[:, 3 * H:4 * H] + 0.5
        c_new = f * c + i * g
        h_new = o * jnp.tanh(c_new)
        return h_new, c_new

    z = jnp.zeros((B, H), jnp.float32)
    h0, c0, h1, c1 = z, z, z, z
    out_acc = jnp.zeros((B, OUT), jnp.float32)

    # --- (2) statically unrolled recurrence; only h @ W_hh matmuls remain
    #         on the serial dependency chain.  Weight Refs are read at the
    #         point of use so the compiler chooses residency (scales with H).
    for t in range(T):
        if t == 0:
            # initial states are exactly zero -> skip the recurrent dots.
            gates0 = pre0[0:B, :]
            h0, c0 = gates_to_hc(gates0, c0)
            gates1 = (jnp.dot(h0, w_ih1_ref[...],
                              preferred_element_type=jnp.float32)
                      + b1_ref[...])
            h1, c1 = gates_to_hc(gates1, c1)
        else:
            # h1_prev @ W_hh1 issued first: depends only on the previous step,
            # overlaps with layer-0 of this step.
            rec1 = jnp.dot(h1, w_hh1_ref[...],
                           preferred_element_type=jnp.float32)
            gates0 = (pre0[t * B:(t + 1) * B, :]
                      + jnp.dot(h0, w_hh0_ref[...],
                                preferred_element_type=jnp.float32))
            h0, c0 = gates_to_hc(gates0, c0)
            gates1 = (jnp.dot(h0, w_ih1_ref[...],
                              preferred_element_type=jnp.float32)
                      + rec1 + b1_ref[...])
            h1, c1 = gates_to_hc(gates1, c1)

        # --- (3) output Linear accumulated per step (hides under the next
        #         step's recurrence); tanh + bias applied once after the loop.
        out_acc = out_acc + jnp.dot(h1, w_out_ref[t],
                                    preferred_element_type=jnp.float32)

    out_ref[...] = jnp.tanh(out_acc + b_out_ref[...])
    hn_ref[0] = h0
    hn_ref[1] = h1
    cn_ref[0] = c0
    cn_ref[1] = c1


def init_params(key, input_features, hidden_dim, output_features, lookback):
    """Deterministic synthetic parameters (PyTorch weight shapes)."""
    ks = jax.random.split(key, 12)
    s = 0.1
    F, H, OUT, T = input_features, hidden_dim, output_features, lookback
    return {
        "w_in":  s * jax.random.normal(ks[0], (H, F), jnp.float32),   # Linear (out,in)
        "b_in":  s * jax.random.normal(ks[1], (H,), jnp.float32),
        "w_ih0": s * jax.random.normal(ks[2], (4 * H, H), jnp.float32),
        "w_hh0": s * jax.random.normal(ks[3], (4 * H, H), jnp.float32),
        "b_ih0": s * jax.random.normal(ks[4], (4 * H,), jnp.float32),
        "b_hh0": s * jax.random.normal(ks[5], (4 * H,), jnp.float32),
        "w_ih1": s * jax.random.normal(ks[6], (4 * H, H), jnp.float32),
        "w_hh1": s * jax.random.normal(ks[7], (4 * H, H), jnp.float32),
        "b_ih1": s * jax.random.normal(ks[8], (4 * H,), jnp.float32),
        "b_hh1": s * jax.random.normal(ks[9], (4 * H,), jnp.float32),
        "w_out": s * jax.random.normal(ks[10], (OUT, T * H), jnp.float32),
        "b_out": s * jax.random.normal(ks[11], (OUT,), jnp.float32),
    }


@jax.jit
def lstm_autoregressive_forward(x, params):
    """x: (B, T, F) -> (output (B,1,OUT), hn (2,B,H), cn (2,B,H))."""
    B, T, F = x.shape
    H = params["w_in"].shape[0]
    OUT = params["w_out"].shape[0]

    # --- batch padded to a full 8-sublane tile (zero rows; sliced off after).
    B_pad = max(8, ((B + 7) // 8) * 8)

    # --- weight-only preprocessing (layout + fold + 0.5 gate pre-scale),
    #     plain JAX in the wrapper.  PyTorch gate order: i, f, g, o.
    gate_scale = jnp.concatenate([jnp.full((2 * H,), 0.5, jnp.float32),   # i, f
                                  jnp.ones((H,), jnp.float32),            # g
                                  jnp.full((H,), 0.5, jnp.float32)])      # o

    w_in_t = params["w_in"].T                                    # (F, H)
    w_ih0_t = params["w_ih0"].T                                  # (H, 4H)
    w_fold = (w_in_t @ w_ih0_t) * gate_scale[None, :]            # (F, 4H)
    b_fold = ((params["b_in"] @ w_ih0_t
               + params["b_ih0"] + params["b_hh0"])
              * gate_scale)[None, :]                             # (1, 4H)
    w_hh0 = params["w_hh0"].T * gate_scale[None, :]              # (H, 4H)
    w_ih1 = params["w_ih1"].T * gate_scale[None, :]              # (H, 4H)
    w_hh1 = params["w_hh1"].T * gate_scale[None, :]              # (H, 4H)
    b1 = ((params["b_ih1"] + params["b_hh1"])
          * gate_scale)[None, :]                                 # (1, 4H)
    w_out = params["w_out"].T.reshape(T, H, OUT)                 # (T, H, OUT)
    b_out = params["b_out"][None, :]                             # (1, OUT)

    # time-major 2-D input, batch-padded: row t*B_pad + b = x_pad[b, t, :]
    x_pad = jnp.pad(x.astype(jnp.float32),
                    ((0, B_pad - B), (0, 0), (0, 0)))
    x_tm = jnp.transpose(x_pad, (1, 0, 2)).reshape(T * B_pad, F)

    vmem = pl.BlockSpec(memory_space=pltpu.MemorySpace.VMEM)
    out_p, hn_p, cn_p = pl.pallas_call(
        _lstm_autoreg_kernel,
        out_shape=(
            jax.ShapeDtypeStruct((B_pad, OUT), jnp.float32),
            jax.ShapeDtypeStruct((2, B_pad, H), jnp.float32),
            jax.ShapeDtypeStruct((2, B_pad, H), jnp.float32),
        ),
        in_specs=[vmem] * 9,
        out_specs=(vmem, vmem, vmem),
    )(x_tm, w_fold, b_fold, w_hh0, w_ih1, w_hh1, b1, w_out, b_out)

    out = out_p[:B].reshape(B, 1, OUT)
    hn = hn_p[:, :B, :]
    cn = cn_p[:, :B, :]
    return out, hn, cn


def _ref_forward(x, params):
    """Pure-JAX reference mirroring PyTorch eval-mode semantics."""
    B, T, F = x.shape
    H = params["w_in"].shape[0]
    x_proj = x @ params["w_in"].T + params["b_in"]               # (B,T,H)

    def run_layer(inp, w_ih, w_hh, b_ih, b_hh):
        h = jnp.zeros((B, H), jnp.float32)
        c = jnp.zeros((B, H), jnp.float32)
        outs = []
        for t in range(T):
            gates = inp[:, t, :] @ w_ih.T + b_ih + h @ w_hh.T + b_hh
            i = jax.nn.sigmoid(gates[:, :H])
            f = jax.nn.sigmoid(gates[:, H:2 * H])
            g = jnp.tanh(gates[:, 2 * H:3 * H])
            o = jax.nn.sigmoid(gates[:, 3 * H:])
            c = f * c + i * g
            h = o * jnp.tanh(c)
            outs.append(h)
        return jnp.stack(outs, axis=1), h, c

    y0, h0, c0 = run_layer(x_proj, params["w_ih0"], params["w_hh0"],
                           params["b_ih0"], params["b_hh0"])
    y1, h1, c1 = run_layer(y0, params["w_ih1"], params["w_hh1"],
                           params["b_ih1"], params["b_hh1"])
    flat = y1.reshape(B, 1, T * H)
    out = jnp.tanh(flat @ params["w_out"].T + params["b_out"])
    return out, jnp.stack([h0, h1]), jnp.stack([c0, c1])


if __name__ == "__main__":
    B, T, F, H, OUT = 2, 8, 4, 32, 4     # lookback=8, hidden_dim=32
    key = jax.random.PRNGKey(0)
    k_x, k_p = jax.random.split(key)
    x = jax.random.normal(k_x, (B, T, F), jnp.float32)
    params = init_params(k_p, F, H, OUT, T)

    out, hn, cn = lstm_autoregressive_forward(x, params)
    jax.block_until_ready((out, hn, cn))

    out_r, hn_r, cn_r = _ref_forward(x, params)
    assert out.shape == (B, 1, OUT) and hn.shape == (2, B, H) and cn.shape == (2, B, H)
    assert jnp.allclose(out, out_r, atol=1e-5, rtol=1e-5)
    assert jnp.allclose(hn, hn_r, atol=1e-5, rtol=1e-5)
    assert jnp.allclose(cn, cn_r, atol=1e-5, rtol=1e-5)

    print("KERNEL_OK")
</pallas_src>

<mosaic_0001>
module attributes {stable_mosaic.version = 11 : i64} {
  func.func @_lstm_autoreg_kernel(%arg0: memref<64x4xf32, #tpu.memory_space<vmem>>, %arg1: memref<4x128xf32, #tpu.memory_space<vmem>>, %arg2: memref<1x128xf32, #tpu.memory_space<vmem>>, %arg3: memref<32x128xf32, #tpu.memory_space<vmem>>, %arg4: memref<32x128xf32, #tpu.memory_space<vmem>>, %arg5: memref<32x128xf32, #tpu.memory_space<vmem>>, %arg6: memref<1x128xf32, #tpu.memory_space<vmem>>, %arg7: memref<8x32x4xf32, #tpu.memory_space<vmem>>, %arg8: memref<1x4xf32, #tpu.memory_space<vmem>>, %arg9: memref<8x4xf32, #tpu.memory_space<vmem>>, %arg10: memref<2x8x32xf32, #tpu.memory_space<vmem>>, %arg11: memref<2x8x32xf32, #tpu.memory_space<vmem>>) attributes {dimension_semantics = [], scalar_prefetch = 0 : i64, scratch_operands = 0 : i64, tpu.core_type = #tpu.core_type<tc>} {
    %c0 = arith.constant 0 : index
    %c0_0 = arith.constant 0 : index
    %0 = vector.load %arg0[%c0, %c0_0] : memref<64x4xf32, #tpu.memory_space<vmem>>, vector<64x4xf32>
    %c0_1 = arith.constant 0 : index
    %c0_2 = arith.constant 0 : index
    %1 = vector.load %arg1[%c0_1, %c0_2] : memref<4x128xf32, #tpu.memory_space<vmem>>, vector<4x128xf32>
    %cst = arith.constant dense<0.000000e+00> : vector<64x128xf32>
    %2 = tpu.matmul %0, %1, %cst {dimension_numbers = #tpu.dot_dimension_numbers<[1], [0], [0], [1], [0, 0, 1, 1], [], []>} : vector<64x4xf32>, vector<4x128xf32>, vector<64x128xf32> -> vector<64x128xf32>
    %c0_3 = arith.constant 0 : index
    %c0_4 = arith.constant 0 : index
    %3 = vector.load %arg2[%c0_3, %c0_4] : memref<1x128xf32, #tpu.memory_space<vmem>>, vector<1x128xf32>
    %4 = vector.broadcast %3 : vector<1x128xf32> to vector<64x128xf32>
    %5 = arith.addf %2, %4 : vector<64x128xf32>
    %cst_5 = arith.constant 0.000000e+00 : f32
    %6 = vector.broadcast %cst_5 : f32 to vector<8x32xf32>
    %cst_6 = arith.constant 0.000000e+00 : f32
    %7 = vector.broadcast %cst_6 : f32 to vector<8x4xf32>
    %8 = vector.extract_strided_slice %5 {offsets = [0, 0], sizes = [8, 128], strides = [1, 1]} : vector<64x128xf32> to vector<8x128xf32>
    %9 = math.tanh %8 : vector<8x128xf32>
    %10 = vector.extract_strided_slice %9 {offsets = [0, 0], sizes = [8, 32], strides = [1, 1]} : vector<8x128xf32> to vector<8x32xf32>
    %cst_7 = arith.constant 5.000000e-01 : f32
    %11 = vector.broadcast %cst_7 : f32 to vector<8x32xf32>
    %12 = arith.mulf %11, %10 : vector<8x32xf32>
    %cst_8 = arith.constant 5.000000e-01 : f32
    %13 = vector.broadcast %cst_8 : f32 to vector<8x32xf32>
    %14 = arith.addf %12, %13 : vector<8x32xf32>
    %15 = vector.extract_strided_slice %9 {offsets = [0, 32], sizes = [8, 32], strides = [1, 1]} : vector<8x128xf32> to vector<8x32xf32>
    %cst_9 = arith.constant 5.000000e-01 : f32
    %16 = vector.broadcast %cst_9 : f32 to vector<8x32xf32>
    %17 = arith.mulf %16, %15 : vector<8x32xf32>
    %cst_10 = arith.constant 5.000000e-01 : f32
    %18 = vector.broadcast %cst_10 : f32 to vector<8x32xf32>
    %19 = arith.addf %17, %18 : vector<8x32xf32>
    %20 = vector.extract_strided_slice %9 {offsets = [0, 64], sizes = [8, 32], strides = [1, 1]} : vector<8x128xf32> to vector<8x32xf32>
    %21 = vector.extract_strided_slice %9 {offsets = [0, 96], sizes = [8, 32], strides = [1, 1]} : vector<8x128xf32> to vector<8x32xf32>
    %cst_11 = arith.constant 5.000000e-01 : f32
    %22 = vector.broadcast %cst_11 : f32 to vector<8x32xf32>
    %23 = arith.mulf %22, %21 : vector<8x32xf32>
    %cst_12 = arith.constant 5.000000e-01 : f32
    %24 = vector.broadcast %cst_12 : f32 to vector<8x32xf32>
    %25 = arith.addf %23, %24 : vector<8x32xf32>
    %26 = arith.mulf %19, %6 : vector<8x32xf32>
    %27 = arith.mulf %14, %20 : vector<8x32xf32>
    %28 = arith.addf %26, %27 : vector<8x32xf32>
    %29 = math.tanh %28 : vector<8x32xf32>
    %30 = arith.mulf %25, %29 : vector<8x32xf32>
    %c0_13 = arith.constant 0 : index
    %c0_14 = arith.constant 0 : index
    %31 = vector.load %arg4[%c0_13, %c0_14] : memref<32x128xf32, #tpu.memory_space<vmem>>, vector<32x128xf32>
    %cst_15 = arith.constant dense<0.000000e+00> : vector<8x128xf32>
    %32 = tpu.matmul %30, %31, %cst_15 {dimension_numbers = #tpu.dot_dimension_numbers<[1], [0], [0], [1], [0, 0, 1, 1], [], []>} : vector<8x32xf32>, vector<32x128xf32>, vector<8x128xf32> -> vector<8x128xf32>
    %c0_16 = arith.constant 0 : index
    %c0_17 = arith.constant 0 : index
    %33 = vector.load %arg6[%c0_16, %c0_17] : memref<1x128xf32, #tpu.memory_space<vmem>>, vector<1x128xf32>
    %34 = vector.broadcast %33 : vector<1x128xf32> to vector<8x128xf32>
    %35 = arith.addf %32, %34 : vector<8x128xf32>
    %36 = math.tanh %35 : vector<8x128xf32>
    %37 = vector.extract_strided_slice %36 {offsets = [0, 0], sizes = [8, 32], strides = [1, 1]} : vector<8x128xf32> to vector<8x32xf32>
    %cst_18 = arith.constant 5.000000e-01 : f32
    %38 = vector.broadcast %cst_18 : f32 to vector<8x32xf32>
    %39 = arith.mulf %38, %37 : vector<8x32xf32>
    %cst_19 = arith.constant 5.000000e-01 : f32
    %40 = vector.broadcast %cst_19 : f32 to vector<8x32xf32>
    %41 = arith.addf %39, %40 : vector<8x32xf32>
    %42 = vector.extract_strided_slice %36 {offsets = [0, 32], sizes = [8, 32], strides = [1, 1]} : vector<8x128xf32> to vector<8x32xf32>
    %cst_20 = arith.constant 5.000000e-01 : f32
    %43 = vector.broadcast %cst_20 : f32 to vector<8x32xf32>
    %44 = arith.mulf %43, %42 : vector<8x32xf32>
    %cst_21 = arith.constant 5.000000e-01 : f32
    %45 = vector.broadcast %cst_21 : f32 to vector<8x32xf32>
    %46 = arith.addf %44, %45 : vector<8x32xf32>
    %47 = vector.extract_strided_slice %36 {offsets = [0, 64], sizes = [8, 32], strides = [1, 1]} : vector<8x128xf32> to vector<8x32xf32>
    %48 = vector.extract_strided_slice %36 {offsets = [0, 96], sizes = [8, 32], strides = [1, 1]} : vector<8x128xf32> to vector<8x32xf32>
    %cst_22 = arith.constant 5.000000e-01 : f32
    %49 = vector.broadcast %cst_22 : f32 to vector<8x32xf32>
    %50 = arith.mulf %49, %48 : vector<8x32xf32>
    %cst_23 = arith.constant 5.000000e-01 : f32
    %51 = vector.broadcast %cst_23 : f32 to vector<8x32xf32>
    %52 = arith.addf %50, %51 : vector<8x32xf32>
    %53 = arith.mulf %46, %6 : vector<8x32xf32>
    %54 = arith.mulf %41, %47 : vector<8x32xf32>
    %55 = arith.addf %53, %54 : vector<8x32xf32>
    %56 = math.tanh %55 : vector<8x32xf32>
    %57 = arith.mulf %52, %56 : vector<8x32xf32>
    %c0_24 = arith.constant 0 : index
    %c0_25 = arith.constant 0 : index
    %c0_26 = arith.constant 0 : index
    %58 = vector.load %arg7[%c0_24, %c0_25, %c0_26] : memref<8x32x4xf32, #tpu.memory_space<vmem>>, vector<1x32x4xf32>
    %59 = vector.shape_cast %58 : vector<1x32x4xf32> to vector<32x4xf32>
    %cst_27 = arith.constant dense<0.000000e+00> : vector<8x4xf32>
    %60 = tpu.matmul %57, %59, %cst_27 {dimension_numbers = #tpu.dot_dimension_numbers<[1], [0], [0], [1], [0, 0, 1, 1], [], []>} : vector<8x32xf32>, vector<32x4xf32>, vector<8x4xf32> -> vector<8x4xf32>
    %61 = arith.addf %7, %60 : vector<8x4xf32>
    %c0_28 = arith.constant 0 : index
    %c0_29 = arith.constant 0 : index
    %62 = vector.load %arg5[%c0_28, %c0_29] : memref<32x128xf32, #tpu.memory_space<vmem>>, vector<32x128xf32>
    %cst_30 = arith.constant dense<0.000000e+00> : vector<8x128xf32>
    %63 = tpu.matmul %57, %62, %cst_30 {dimension_numbers = #tpu.dot_dimension_numbers<[1], [0], [0], [1], [0, 0, 1, 1], [], []>} : vector<8x32xf32>, vector<32x128xf32>, vector<8x128xf32> -> vector<8x128xf32>
    %64 = vector.extract_strided_slice %5 {offsets = [8, 0], sizes = [8, 128], strides = [1, 1]} : vector<64x128xf32> to vector<8x128xf32>
    %c0_31 = arith.constant 0 : index
    %c0_32 = arith.constant 0 : index
    %65 = vector.load %arg3[%c0_31, %c0_32] : memref<32x128xf32, #tpu.memory_space<vmem>>, vector<32x128xf32>
    %cst_33 = arith.constant dense<0.000000e+00> : vector<8x128xf32>
    %66 = tpu.matmul %30, %65, %cst_33 {dimension_numbers = #tpu.dot_dimension_numbers<[1], [0], [0], [1], [0, 0, 1, 1], [], []>} : vector<8x32xf32>, vector<32x128xf32>, vector<8x128xf32> -> vector<8x128xf32>
    %67 = arith.addf %64, %66 : vector<8x128xf32>
    %68 = math.tanh %67 : vector<8x128xf32>
    %69 = vector.extract_strided_slice %68 {offsets = [0, 0], sizes = [8, 32], strides = [1, 1]} : vector<8x128xf32> to vector<8x32xf32>
    %cst_34 = arith.constant 5.000000e-01 : f32
    %70 = vector.broadcast %cst_34 : f32 to vector<8x32xf32>
    %71 = arith.mulf %70, %69 : vector<8x32xf32>
    %cst_35 = arith.constant 5.000000e-01 : f32
    %72 = vector.broadcast %cst_35 : f32 to vector<8x32xf32>
    %73 = arith.addf %71, %72 : vector<8x32xf32>
    %74 = vector.extract_strided_slice %68 {offsets = [0, 32], sizes = [8, 32], strides = [1, 1]} : vector<8x128xf32> to vector<8x32xf32>
    %cst_36 = arith.constant 5.000000e-01 : f32
    %75 = vector.broadcast %cst_36 : f32 to vector<8x32xf32>
    %76 = arith.mulf %75, %74 : vector<8x32xf32>
    %cst_37 = arith.constant 5.000000e-01 : f32
    %77 = vector.broadcast %cst_37 : f32 to vector<8x32xf32>
    %78 = arith.addf %76, %77 : vector<8x32xf32>
    %79 = vector.extract_strided_slice %68 {offsets = [0, 64], sizes = [8, 32], strides = [1, 1]} : vector<8x128xf32> to vector<8x32xf32>
    %80 = vector.extract_strided_slice %68 {offsets = [0, 96], sizes = [8, 32], strides = [1, 1]} : vector<8x128xf32> to vector<8x32xf32>
    %cst_38 = arith.constant 5.000000e-01 : f32
    %81 = vector.broadcast %cst_38 : f32 to vector<8x32xf32>
    %82 = arith.mulf %81, %80 : vector<8x32xf32>
    %cst_39 = arith.constant 5.000000e-01 : f32
    %83 = vector.broadcast %cst_39 : f32 to vector<8x32xf32>
    %84 = arith.addf %82, %83 : vector<8x32xf32>
    %85 = arith.mulf %78, %28 : vector<8x32xf32>
    %86 = arith.mulf %73, %79 : vector<8x32xf32>
    %87 = arith.addf %85, %86 : vector<8x32xf32>
    %88 = math.tanh %87 : vector<8x32xf32>
    %89 = arith.mulf %84, %88 : vector<8x32xf32>
    %c0_40 = arith.constant 0 : index
    %c0_41 = arith.constant 0 : index
    %90 = vector.load %arg4[%c0_40, %c0_41] : memref<32x128xf32, #tpu.memory_space<vmem>>, vector<32x128xf32>
    %cst_42 = arith.constant dense<0.000000e+00> : vector<8x128xf32>
    %91 = tpu.matmul %89, %90, %cst_42 {dimension_numbers = #tpu.dot_dimension_numbers<[1], [0], [0], [1], [0, 0, 1, 1], [], []>} : vector<8x32xf32>, vector<32x128xf32>, vector<8x128xf32> -> vector<8x128xf32>
    %92 = arith.addf %91, %63 : vector<8x128xf32>
    %c0_43 = arith.constant 0 : index
    %c0_44 = arith.constant 0 : index
    %93 = vector.load %arg6[%c0_43, %c0_44] : memref<1x128xf32, #tpu.memory_space<vmem>>, vector<1x128xf32>
    %94 = vector.broadcast %93 : vector<1x128xf32> to vector<8x128xf32>
    %95 = arith.addf %92, %94 : vector<8x128xf32>
    %96 = math.tanh %95 : vector<8x128xf32>
    %97 = vector.extract_strided_slice %96 {offsets = [0, 0], sizes = [8, 32], strides = [1, 1]} : vector<8x128xf32> to vector<8x32xf32>
    %cst_45 = arith.constant 5.000000e-01 : f32
    %98 = vector.broadcast %cst_45 : f32 to vector<8x32xf32>
    %99 = arith.mulf %98, %97 : vector<8x32xf32>
    %cst_46 = arith.constant 5.000000e-01 : f32
    %100 = vector.broadcast %cst_46 : f32 to vector<8x32xf32>
    %101 = arith.addf %99, %100 : vector<8x32xf32>
    %102 = vector.extract_strided_slice %96 {offsets = [0, 32], sizes = [8, 32], strides = [1, 1]} : vector<8x128xf32> to vector<8x32xf32>
    %cst_47 = arith.constant 5.000000e-01 : f32
    %103 = vector.broadcast %cst_47 : f32 to vector<8x32xf32>
    %104 = arith.mulf %103, %102 : vector<8x32xf32>
    %cst_48 = arith.constant 5.000000e-01 : f32
    %105 = vector.broadcast %cst_48 : f32 to vector<8x32xf32>
    %106 = arith.addf %104, %105 : vector<8x32xf32>
    %107 = vector.extract_strided_slice %96 {offsets = [0, 64], sizes = [8, 32], strides = [1, 1]} : vector<8x128xf32> to vector<8x32xf32>
    %108 = vector.extract_strided_slice %96 {offsets = [0, 96], sizes = [8, 32], strides = [1, 1]} : vector<8x128xf32> to vector<8x32xf32>
    %cst_49 = arith.constant 5.000000e-01 : f32
    %109 = vector.broadcast %cst_49 : f32 to vector<8x32xf32>
    %110 = arith.mulf %109, %108 : vector<8x32xf32>
    %cst_50 = arith.constant 5.000000e-01 : f32
    %111 = vector.broadcast %cst_50 : f32 to vector<8x32xf32>
    %112 = arith.addf %110, %111 : vector<8x32xf32>
    %113 = arith.mulf %106, %55 : vector<8x32xf32>
    %114 = arith.mulf %101, %107 : vector<8x32xf32>
    %115 = arith.addf %113, %114 : vector<8x32xf32>
    %116 = math.tanh %115 : vector<8x32xf32>
    %117 = arith.mulf %112, %116 : vector<8x32xf32>
    %c1 = arith.constant 1 : index
    %c0_51 = arith.constant 0 : index
    %c0_52 = arith.constant 0 : index
    %118 = vector.load %arg7[%c1, %c0_51, %c0_52] : memref<8x32x4xf32, #tpu.memory_space<vmem>>, vector<1x32x4xf32>
    %119 = vector.shape_cast %118 : vector<1x32x4xf32> to vector<32x4xf32>
    %cst_53 = arith.constant dense<0.000000e+00> : vector<8x4xf32>
    %120 = tpu.matmul %117, %119, %cst_53 {dimension_numbers = #tpu.dot_dimension_numbers<[1], [0], [0], [1], [0, 0, 1, 1], [], []>} : vector<8x32xf32>, vector<32x4xf32>, vector<8x4xf32> -> vector<8x4xf32>
    %121 = arith.addf %61, %120 : vector<8x4xf32>
    %c0_54 = arith.constant 0 : index
    %c0_55 = arith.constant 0 : index
    %122 = vector.load %arg5[%c0_54, %c0_55] : memref<32x128xf32, #tpu.memory_space<vmem>>, vector<32x128xf32>
    %cst_56 = arith.constant dense<0.000000e+00> : vector<8x128xf32>
    %123 = tpu.matmul %117, %122, %cst_56 {dimension_numbers = #tpu.dot_dimension_numbers<[1], [0], [0], [1], [0, 0, 1, 1], [], []>} : vector<8x32xf32>, vector<32x128xf32>, vector<8x128xf32> -> vector<8x128xf32>
    %124 = vector.extract_strided_slice %5 {offsets = [16, 0], sizes = [8, 128], strides = [1, 1]} : vector<64x128xf32> to vector<8x128xf32>
    %c0_57 = arith.constant 0 : index
    %c0_58 = arith.constant 0 : index
    %125 = vector.load %arg3[%c0_57, %c0_58] : memref<32x128xf32, #tpu.memory_space<vmem>>, vector<32x128xf32>
    %cst_59 = arith.constant dense<0.000000e+00> : vector<8x128xf32>
    %126 = tpu.matmul %89, %125, %cst_59 {dimension_numbers = #tpu.dot_dimension_numbers<[1], [0], [0], [1], [0, 0, 1, 1], [], []>} : vector<8x32xf32>, vector<32x128xf32>, vector<8x128xf32> -> vector<8x128xf32>
    %127 = arith.addf %124, %126 : vector<8x128xf32>
    %128 = math.tanh %127 : vector<8x128xf32>
    %129 = vector.extract_strided_slice %128 {offsets = [0, 0], sizes = [8, 32], strides = [1, 1]} : vector<8x128xf32> to vector<8x32xf32>
    %cst_60 = arith.constant 5.000000e-01 : f32
    %130 = vector.broadcast %cst_60 : f32 to vector<8x32xf32>
    %131 = arith.mulf %130, %129 : vector<8x32xf32>
    %cst_61 = arith.constant 5.000000e-01 : f32
    %132 = vector.broadcast %cst_61 : f32 to vector<8x32xf32>
    %133 = arith.addf %131, %132 : vector<8x32xf32>
    %134 = vector.extract_strided_slice %128 {offsets = [0, 32], sizes = [8, 32], strides = [1, 1]} : vector<8x128xf32> to vector<8x32xf32>
    %cst_62 = arith.constant 5.000000e-01 : f32
    %135 = vector.broadcast %cst_62 : f32 to vector<8x32xf32>
    %136 = arith.mulf %135, %134 : vector<8x32xf32>
    %cst_63 = arith.constant 5.000000e-01 : f32
    %137 = vector.broadcast %cst_63 : f32 to vector<8x32xf32>
    %138 = arith.addf %136, %137 : vector<8x32xf32>
    %139 = vector.extract_strided_slice %128 {offsets = [0, 64], sizes = [8, 32], strides = [1, 1]} : vector<8x128xf32> to vector<8x32xf32>
    %140 = vector.extract_strided_slice %128 {offsets = [0, 96], sizes = [8, 32], strides = [1, 1]} : vector<8x128xf32> to vector<8x32xf32>
    %cst_64 = arith.constant 5.000000e-01 : f32
    %141 = vector.broadcast %cst_64 : f32 to vector<8x32xf32>
    %142 = arith.mulf %141, %140 : vector<8x32xf32>
    %cst_65 = arith.constant 5.000000e-01 : f32
    %143 = vector.broadcast %cst_65 : f32 to vector<8x32xf32>
    %144 = arith.addf %142, %143 : vector<8x32xf32>
    %145 = arith.mulf %138, %87 : vector<8x32xf32>
    %146 = arith.mulf %133, %139 : vector<8x32xf32>
    %147 = arith.addf %145, %146 : vector<8x32xf32>
    %148 = math.tanh %147 : vector<8x32xf32>
    %149 = arith.mulf %144, %148 : vector<8x32xf32>
    %c0_66 = arith.constant 0 : index
    %c0_67 = arith.constant 0 : index
    %150 = vector.load %arg4[%c0_66, %c0_67] : memref<32x128xf32, #tpu.memory_space<vmem>>, vector<32x128xf32>
    %cst_68 = arith.constant dense<0.000000e+00> : vector<8x128xf32>
    %151 = tpu.matmul %149, %150, %cst_68 {dimension_numbers = #tpu.dot_dimension_numbers<[1], [0], [0], [1], [0, 0, 1, 1], [], []>} : vector<8x32xf32>, vector<32x128xf32>, vector<8x128xf32> -> vector<8x128xf32>
    %152 = arith.addf %151, %123 : vector<8x128xf32>
    %c0_69 = arith.constant 0 : index
    %c0_70 = arith.constant 0 : index
    %153 = vector.load %arg6[%c0_69, %c0_70] : memref<1x128xf32, #tpu.memory_space<vmem>>, vector<1x128xf32>
    %154 = vector.broadcast %153 : vector<1x128xf32> to vector<8x128xf32>
    %155 = arith.addf %152, %154 : vector<8x128xf32>
    %156 = math.tanh %155 : vector<8x128xf32>
    %157 = vector.extract_strided_slice %156 {offsets = [0, 0], sizes = [8, 32], strides = [1, 1]} : vector<8x128xf32> to vector<8x32xf32>
    %cst_71 = arith.constant 5.000000e-01 : f32
    %158 = vector.broadcast %cst_71 : f32 to vector<8x32xf32>
    %159 = arith.mulf %158, %157 : vector<8x32xf32>
    %cst_72 = arith.constant 5.000000e-01 : f32
    %160 = vector.broadcast %cst_72 : f32 to vector<8x32xf32>
    %161 = arith.addf %159, %160 : vector<8x32xf32>
    %162 = vector.extract_strided_slice %156 {offsets = [0, 32], sizes = [8, 32], strides = [1, 1]} : vector<8x128xf32> to vector<8x32xf32>
    %cst_73 = arith.constant 5.000000e-01 : f32
    %163 = vector.broadcast %cst_73 : f32 to vector<8x32xf32>
    %164 = arith.mulf %163, %162 : vector<8x32xf32>
    %cst_74 = arith.constant 5.000000e-01 : f32
    %165 = vector.broadcast %cst_74 : f32 to vector<8x32xf32>
    %166 = arith.addf %164, %165 : vector<8x32xf32>
    %167 = vector.extract_strided_slice %156 {offsets = [0, 64], sizes = [8, 32], strides = [1, 1]} : vector<8x128xf32> to vector<8x32xf32>
    %168 = vector.extract_strided_slice %156 {offsets = [0, 96], sizes = [8, 32], strides = [1, 1]} : vector<8x128xf32> to vector<8x32xf32>
    %cst_75 = arith.constant 5.000000e-01 : f32
    %169 = vector.broadcast %cst_75 : f32 to vector<8x32xf32>
    %170 = arith.mulf %169, %168 : vector<8x32xf32>
    %cst_76 = arith.constant 5.000000e-01 : f32
    %171 = vector.broadcast %cst_76 : f32 to vector<8x32xf32>
    %172 = arith.addf %170, %171 : vector<8x32xf32>
    %173 = arith.mulf %166, %115 : vector<8x32xf32>
    %174 = arith.mulf %161, %167 : vector<8x32xf32>
    %175 = arith.addf %173, %174 : vector<8x32xf32>
    %176 = math.tanh %175 : vector<8x32xf32>
    %177 = arith.mulf %172, %176 : vector<8x32xf32>
    %c2 = arith.constant 2 : index
    %c0_77 = arith.constant 0 : index
    %c0_78 = arith.constant 0 : index
    %178 = vector.load %arg7[%c2, %c0_77, %c0_78] : memref<8x32x4xf32, #tpu.memory_space<vmem>>, vector<1x32x4xf32>
    %179 = vector.shape_cast %178 : vector<1x32x4xf32> to vector<32x4xf32>
    %cst_79 = arith.constant dense<0.000000e+00> : vector<8x4xf32>
    %180 = tpu.matmul %177, %179, %cst_79 {dimension_numbers = #tpu.dot_dimension_numbers<[1], [0], [0], [1], [0, 0, 1, 1], [], []>} : vector<8x32xf32>, vector<32x4xf32>, vector<8x4xf32> -> vector<8x4xf32>
    %181 = arith.addf %121, %180 : vector<8x4xf32>
    %c0_80 = arith.constant 0 : index
    %c0_81 = arith.constant 0 : index
    %182 = vector.load %arg5[%c0_80, %c0_81] : memref<32x128xf32, #tpu.memory_space<vmem>>, vector<32x128xf32>
    %cst_82 = arith.constant dense<0.000000e+00> : vector<8x128xf32>
    %183 = tpu.matmul %177, %182, %cst_82 {dimension_numbers = #tpu.dot_dimension_numbers<[1], [0], [0], [1], [0, 0, 1, 1], [], []>} : vector<8x32xf32>, vector<32x128xf32>, vector<8x128xf32> -> vector<8x128xf32>
    %184 = vector.extract_strided_slice %5 {offsets = [24, 0], sizes = [8, 128], strides = [1, 1]} : vector<64x128xf32> to vector<8x128xf32>
    %c0_83 = arith.constant 0 : index
    %c0_84 = arith.constant 0 : index
    %185 = vector.load %arg3[%c0_83, %c0_84] : memref<32x128xf32, #tpu.memory_space<vmem>>, vector<32x128xf32>
    %cst_85 = arith.constant dense<0.000000e+00> : vector<8x128xf32>
    %186 = tpu.matmul %149, %185, %cst_85 {dimension_numbers = #tpu.dot_dimension_numbers<[1], [0], [0], [1], [0, 0, 1, 1], [], []>} : vector<8x32xf32>, vector<32x128xf32>, vector<8x128xf32> -> vector<8x128xf32>
    %187 = arith.addf %184, %186 : vector<8x128xf32>
    %188 = math.tanh %187 : vector<8x128xf32>
    %189 = vector.extract_strided_slice %188 {offsets = [0, 0], sizes = [8, 32], strides = [1, 1]} : vector<8x128xf32> to vector<8x32xf32>
    %cst_86 = arith.constant 5.000000e-01 : f32
    %190 = vector.broadcast %cst_86 : f32 to vector<8x32xf32>
    %191 = arith.mulf %190, %189 : vector<8x32xf32>
    %cst_87 = arith.constant 5.000000e-01 : f32
    %192 = vector.broadcast %cst_87 : f32 to vector<8x32xf32>
    %193 = arith.addf %191, %192 : vector<8x32xf32>
    %194 = vector.extract_strided_slice %188 {offsets = [0, 32], sizes = [8, 32], strides = [1, 1]} : vector<8x128xf32> to vector<8x32xf32>
    %cst_88 = arith.constant 5.000000e-01 : f32
    %195 = vector.broadcast %cst_88 : f32 to vector<8x32xf32>
    %196 = arith.mulf %195, %194 : vector<8x32xf32>
    %cst_89 = arith.constant 5.000000e-01 : f32
    %197 = vector.broadcast %cst_89 : f32 to vector<8x32xf32>
    %198 = arith.addf %196, %197 : vector<8x32xf32>
    %199 = vector.extract_strided_slice %188 {offsets = [0, 64], sizes = [8, 32], strides = [1, 1]} : vector<8x128xf32> to vector<8x32xf32>
    %200 = vector.extract_strided_slice %188 {offsets = [0, 96], sizes = [8, 32], strides = [1, 1]} : vector<8x128xf32> to vector<8x32xf32>
    %cst_90 = arith.constant 5.000000e-01 : f32
    %201 = vector.broadcast %cst_90 : f32 to vector<8x32xf32>
    %202 = arith.mulf %201, %200 : vector<8x32xf32>
    %cst_91 = arith.constant 5.000000e-01 : f32
    %203 = vector.broadcast %cst_91 : f32 to vector<8x32xf32>
    %204 = arith.addf %202, %203 : vector<8x32xf32>
    %205 = arith.mulf %198, %147 : vector<8x32xf32>
    %206 = arith.mulf %193, %199 : vector<8x32xf32>
    %207 = arith.addf %205, %206 : vector<8x32xf32>
    %208 = math.tanh %207 : vector<8x32xf32>
    %209 = arith.mulf %204, %208 : vector<8x32xf32>
    %c0_92 = arith.constant 0 : index
    %c0_93 = arith.constant 0 : index
    %210 = vector.load %arg4[%c0_92, %c0_93] : memref<32x128xf32, #tpu.memory_space<vmem>>, vector<32x128xf32>
    %cst_94 = arith.constant dense<0.000000e+00> : vector<8x128xf32>
    %211 = tpu.matmul %209, %210, %cst_94 {dimension_numbers = #tpu.dot_dimension_numbers<[1], [0], [0], [1], [0, 0, 1, 1], [], []>} : vector<8x32xf32>, vector<32x128xf32>, vector<8x128xf32> -> vector<8x128xf32>
    %212 = arith.addf %211, %183 : vector<8x128xf32>
    %c0_95 = arith.constant 0 : index
    %c0_96 = arith.constant 0 : index
    %213 = vector.load %arg6[%c0_95, %c0_96] : memref<1x128xf32, #tpu.memory_space<vmem>>, vector<1x128xf32>
    %214 = vector.broadcast %213 : vector<1x128xf32> to vector<8x128xf32>
    %215 = arith.addf %212, %214 : vector<8x128xf32>
    %216 = math.tanh %215 : vector<8x128xf32>
    %217 = vector.extract_strided_slice %216 {offsets = [0, 0], sizes = [8, 32], strides = [1, 1]} : vector<8x128xf32> to vector<8x32xf32>
    %cst_97 = arith.constant 5.000000e-01 : f32
    %218 = vector.broadcast %cst_97 : f32 to vector<8x32xf32>
    %219 = arith.mulf %218, %217 : vector<8x32xf32>
    %cst_98 = arith.constant 5.000000e-01 : f32
    %220 = vector.broadcast %cst_98 : f32 to vector<8x32xf32>
    %221 = arith.addf %219, %220 : vector<8x32xf32>
    %222 = vector.extract_strided_slice %216 {offsets = [0, 32], sizes = [8, 32], strides = [1, 1]} : vector<8x128xf32> to vector<8x32xf32>
    %cst_99 = arith.constant 5.000000e-01 : f32
    %223 = vector.broadcast %cst_99 : f32 to vector<8x32xf32>
    %224 = arith.mulf %223, %222 : vector<8x32xf32>
    %cst_100 = arith.constant 5.000000e-01 : f32
    %225 = vector.broadcast %cst_100 : f32 to vector<8x32xf32>
    %226 = arith.addf %224, %225 : vector<8x32xf32>
    %227 = vector.extract_strided_slice %216 {offsets = [0, 64], sizes = [8, 32], strides = [1, 1]} : vector<8x128xf32> to vector<8x32xf32>
    %228 = vector.extract_strided_slice %216 {offsets = [0, 96], sizes = [8, 32], strides = [1, 1]} : vector<8x128xf32> to vector<8x32xf32>
    %cst_101 = arith.constant 5.000000e-01 : f32
    %229 = vector.broadcast %cst_101 : f32 to vector<8x32xf32>
    %230 = arith.mulf %229, %228 : vector<8x32xf32>
    %cst_102 = arith.constant 5.000000e-01 : f32
    %231 = vector.broadcast %cst_102 : f32 to vector<8x32xf32>
    %232 = arith.addf %230, %231 : vector<8x32xf32>
    %233 = arith.mulf %226, %175 : vector<8x32xf32>
    %234 = arith.mulf %221, %227 : vector<8x32xf32>
    %235 = arith.addf %233, %234 : vector<8x32xf32>
    %236 = math.tanh %235 : vector<8x32xf32>
    %237 = arith.mulf %232, %236 : vector<8x32xf32>
    %c3 = arith.constant 3 : index
    %c0_103 = arith.constant 0 : index
    %c0_104 = arith.constant 0 : index
    %238 = vector.load %arg7[%c3, %c0_103, %c0_104] : memref<8x32x4xf32, #tpu.memory_space<vmem>>, vector<1x32x4xf32>
    %239 = vector.shape_cast %238 : vector<1x32x4xf32> to vector<32x4xf32>
    %cst_105 = arith.constant dense<0.000000e+00> : vector<8x4xf32>
    %240 = tpu.matmul %237, %239, %cst_105 {dimension_numbers = #tpu.dot_dimension_numbers<[1], [0], [0], [1], [0, 0, 1, 1], [], []>} : vector<8x32xf32>, vector<32x4xf32>, vector<8x4xf32> -> vector<8x4xf32>
    %241 = arith.addf %181, %240 : vector<8x4xf32>
    %c0_106 = arith.constant 0 : index
    %c0_107 = arith.constant 0 : index
    %242 = vector.load %arg5[%c0_106, %c0_107] : memref<32x128xf32, #tpu.memory_space<vmem>>, vector<32x128xf32>
    %cst_108 = arith.constant dense<0.000000e+00> : vector<8x128xf32>
    %243 = tpu.matmul %237, %242, %cst_108 {dimension_numbers = #tpu.dot_dimension_numbers<[1], [0], [0], [1], [0, 0, 1, 1], [], []>} : vector<8x32xf32>, vector<32x128xf32>, vector<8x128xf32> -> vector<8x128xf32>
    %244 = vector.extract_strided_slice %5 {offsets = [32, 0], sizes = [8, 128], strides = [1, 1]} : vector<64x128xf32> to vector<8x128xf32>
    %c0_109 = arith.constant 0 : index
    %c0_110 = arith.constant 0 : index
    %245 = vector.load %arg3[%c0_109, %c0_110] : memref<32x128xf32, #tpu.memory_space<vmem>>, vector<32x128xf32>
    %cst_111 = arith.constant dense<0.000000e+00> : vector<8x128xf32>
    %246 = tpu.matmul %209, %245, %cst_111 {dimension_numbers = #tpu.dot_dimension_numbers<[1], [0], [0], [1], [0, 0, 1, 1], [], []>} : vector<8x32xf32>, vector<32x128xf32>, vector<8x128xf32> -> vector<8x128xf32>
    %247 = arith.addf %244, %246 : vector<8x128xf32>
    %248 = math.tanh %247 : vector<8x128xf32>
    %249 = vector.extract_strided_slice %248 {offsets = [0, 0], sizes = [8, 32], strides = [1, 1]} : vector<8x128xf32> to vector<8x32xf32>
    %cst_112 = arith.constant 5.000000e-01 : f32
    %250 = vector.broadcast %cst_112 : f32 to vector<8x32xf32>
    %251 = arith.mulf %250, %249 : vector<8x32xf32>
    %cst_113 = arith.constant 5.000000e-01 : f32
    %252 = vector.broadcast %cst_113 : f32 to vector<8x32xf32>
    %253 = arith.addf %251, %252 : vector<8x32xf32>
    %254 = vector.extract_strided_slice %248 {offsets = [0, 32], sizes = [8, 32], strides = [1, 1]} : vector<8x128xf32> to vector<8x32xf32>
    %cst_114 = arith.constant 5.000000e-01 : f32
    %255 = vector.broadcast %cst_114 : f32 to vector<8x32xf32>
    %256 = arith.mulf %255, %254 : vector<8x32xf32>
    %cst_115 = arith.constant 5.000000e-01 : f32
    %257 = vector.broadcast %cst_115 : f32 to vector<8x32xf32>
    %258 = arith.addf %256, %257 : vector<8x32xf32>
    %259 = vector.extract_strided_slice %248 {offsets = [0, 64], sizes = [8, 32], strides = [1, 1]} : vector<8x128xf32> to vector<8x32xf32>
    %260 = vector.extract_strided_slice %248 {offsets = [0, 96], sizes = [8, 32], strides = [1, 1]} : vector<8x128xf32> to vector<8x32xf32>
    %cst_116 = arith.constant 5.000000e-01 : f32
    %261 = vector.broadcast %cst_116 : f32 to vector<8x32xf32>
    %262 = arith.mulf %261, %260 : vector<8x32xf32>
    %cst_117 = arith.constant 5.000000e-01 : f32
    %263 = vector.broadcast %cst_117 : f32 to vector<8x32xf32>
    %264 = arith.addf %262, %263 : vector<8x32xf32>
    %265 = arith.mulf %258, %207 : vector<8x32xf32>
    %266 = arith.mulf %253, %259 : vector<8x32xf32>
    %267 = arith.addf %265, %266 : vector<8x32xf32>
    %268 = math.tanh %267 : vector<8x32xf32>
    %269 = arith.mulf %264, %268 : vector<8x32xf32>
    %c0_118 = arith.constant 0 : index
    %c0_119 = arith.constant 0 : index
    %270 = vector.load %arg4[%c0_118, %c0_119] : memref<32x128xf32, #tpu.memory_space<vmem>>, vector<32x128xf32>
    %cst_120 = arith.constant dense<0.000000e+00> : vector<8x128xf32>
    %271 = tpu.matmul %269, %270, %cst_120 {dimension_numbers = #tpu.dot_dimension_numbers<[1], [0], [0], [1], [0, 0, 1, 1], [], []>} : vector<8x32xf32>, vector<32x128xf32>, vector<8x128xf32> -> vector<8x128xf32>
    %272 = arith.addf %271, %243 : vector<8x128xf32>
    %c0_121 = arith.constant 0 : index
    %c0_122 = arith.constant 0 : index
    %273 = vector.load %arg6[%c0_121, %c0_122] : memref<1x128xf32, #tpu.memory_space<vmem>>, vector<1x128xf32>
    %274 = vector.broadcast %273 : vector<1x128xf32> to vector<8x128xf32>
    %275 = arith.addf %272, %274 : vector<8x128xf32>
    %276 = math.tanh %275 : vector<8x128xf32>
    %277 = vector.extract_strided_slice %276 {offsets = [0, 0], sizes = [8, 32], strides = [1, 1]} : vector<8x128xf32> to vector<8x32xf32>
    %cst_123 = arith.constant 5.000000e-01 : f32
    %278 = vector.broadcast %cst_123 : f32 to vector<8x32xf32>
    %279 = arith.mulf %278, %277 : vector<8x32xf32>
    %cst_124 = arith.constant 5.000000e-01 : f32
    %280 = vector.broadcast %cst_124 : f32 to vector<8x32xf32>
    %281 = arith.addf %279, %280 : vector<8x32xf32>
    %282 = vector.extract_strided_slice %276 {offsets = [0, 32], sizes = [8, 32], strides = [1, 1]} : vector<8x128xf32> to vector<8x32xf32>
    %cst_125 = arith.constant 5.000000e-01 : f32
    %283 = vector.broadcast %cst_125 : f32 to vector<8x32xf32>
    %284 = arith.mulf %283, %282 : vector<8x32xf32>
    %cst_126 = arith.constant 5.000000e-01 : f32
    %285 = vector.broadcast %cst_126 : f32 to vector<8x32xf32>
    %286 = arith.addf %284, %285 : vector<8x32xf32>
    %287 = vector.extract_strided_slice %276 {offsets = [0, 64], sizes = [8, 32], strides = [1, 1]} : vector<8x128xf32> to vector<8x32xf32>
    %288 = vector.extract_strided_slice %276 {offsets = [0, 96], sizes = [8, 32], strides = [1, 1]} : vector<8x128xf32> to vector<8x32xf32>
    %cst_127 = arith.constant 5.000000e-01 : f32
    %289 = vector.broadcast %cst_127 : f32 to vector<8x32xf32>
    %290 = arith.mulf %289, %288 : vector<8x32xf32>
    %cst_128 = arith.constant 5.000000e-01 : f32
    %291 = vector.broadcast %cst_128 : f32 to vector<8x32xf32>
    %292 = arith.addf %290, %291 : vector<8x32xf32>
    %293 = arith.mulf %286, %235 : vector<8x32xf32>
    %294 = arith.mulf %281, %287 : vector<8x32xf32>
    %295 = arith.addf %293, %294 : vector<8x32xf32>
    %296 = math.tanh %295 : vector<8x32xf32>
    %297 = arith.mulf %292, %296 : vector<8x32xf32>
    %c4 = arith.constant 4 : index
    %c0_129 = arith.constant 0 : index
    %c0_130 = arith.constant 0 : index
    %298 = vector.load %arg7[%c4, %c0_129, %c0_130] : memref<8x32x4xf32, #tpu.memory_space<vmem>>, vector<1x32x4xf32>
    %299 = vector.shape_cast %298 : vector<1x32x4xf32> to vector<32x4xf32>
    %cst_131 = arith.constant dense<0.000000e+00> : vector<8x4xf32>
    %300 = tpu.matmul %297, %299, %cst_131 {dimension_numbers = #tpu.dot_dimension_numbers<[1], [0], [0], [1], [0, 0, 1, 1], [], []>} : vector<8x32xf32>, vector<32x4xf32>, vector<8x4xf32> -> vector<8x4xf32>
    %301 = arith.addf %241, %300 : vector<8x4xf32>
    %c0_132 = arith.constant 0 : index
    %c0_133 = arith.constant 0 : index
    %302 = vector.load %arg5[%c0_132, %c0_133] : memref<32x128xf32, #tpu.memory_space<vmem>>, vector<32x128xf32>
    %cst_134 = arith.constant dense<0.000000e+00> : vector<8x128xf32>
    %303 = tpu.matmul %297, %302, %cst_134 {dimension_numbers = #tpu.dot_dimension_numbers<[1], [0], [0], [1], [0, 0, 1, 1], [], []>} : vector<8x32xf32>, vector<32x128xf32>, vector<8x128xf32> -> vector<8x128xf32>
    %304 = vector.extract_strided_slice %5 {offsets = [40, 0], sizes = [8, 128], strides = [1, 1]} : vector<64x128xf32> to vector<8x128xf32>
    %c0_135 = arith.constant 0 : index
    %c0_136 = arith.constant 0 : index
    %305 = vector.load %arg3[%c0_135, %c0_136] : memref<32x128xf32, #tpu.memory_space<vmem>>, vector<32x128xf32>
    %cst_137 = arith.constant dense<0.000000e+00> : vector<8x128xf32>
    %306 = tpu.matmul %269, %305, %cst_137 {dimension_numbers = #tpu.dot_dimension_numbers<[1], [0], [0], [1], [0, 0, 1, 1], [], []>} : vector<8x32xf32>, vector<32x128xf32>, vector<8x128xf32> -> vector<8x128xf32>
    %307 = arith.addf %304, %306 : vector<8x128xf32>
    %308 = math.tanh %307 : vector<8x128xf32>
    %309 = vector.extract_strided_slice %308 {offsets = [0, 0], sizes = [8, 32], strides = [1, 1]} : vector<8x128xf32> to vector<8x32xf32>
    %cst_138 = arith.constant 5.000000e-01 : f32
    %310 = vector.broadcast %cst_138 : f32 to vector<8x32xf32>
    %311 = arith.mulf %310, %309 : vector<8x32xf32>
    %cst_139 = arith.constant 5.000000e-01 : f32
    %312 = vector.broadcast %cst_139 : f32 to vector<8x32xf32>
    %313 = arith.addf %311, %312 : vector<8x32xf32>
    %314 = vector.extract_strided_slice %308 {offsets = [0, 32], sizes = [8, 32], strides = [1, 1]} : vector<8x128xf32> to vector<8x32xf32>
    %cst_140 = arith.constant 5.000000e-01 : f32
    %315 = vector.broadcast %cst_140 : f32 to vector<8x32xf32>
    %316 = arith.mulf %315, %314 : vector<8x32xf32>
    %cst_141 = arith.constant 5.000000e-01 : f32
    %317 = vector.broadcast %cst_141 : f32 to vector<8x32xf32>
    %318 = arith.addf %316, %317 : vector<8x32xf32>
    %319 = vector.extract_strided_slice %308 {offsets = [0, 64], sizes = [8, 32], strides = [1, 1]} : vector<8x128xf32> to vector<8x32xf32>
    %320 = vector.extract_strided_slice %308 {offsets = [0, 96], sizes = [8, 32], strides = [1, 1]} : vector<8x128xf32> to vector<8x32xf32>
    %cst_142 = arith.constant 5.000000e-01 : f32
    %321 = vector.broadcast %cst_142 : f32 to vector<8x32xf32>
    %322 = arith.mulf %321, %320 : vector<8x32xf32>
    %cst_143 = arith.constant 5.000000e-01 : f32
    %323 = vector.broadcast %cst_143 : f32 to vector<8x32xf32>
    %324 = arith.addf %322, %323 : vector<8x32xf32>
    %325 = arith.mulf %318, %267 : vector<8x32xf32>
    %326 = arith.mulf %313, %319 : vector<8x32xf32>
    %327 = arith.addf %325, %326 : vector<8x32xf32>
    %328 = math.tanh %327 : vector<8x32xf32>
    %329 = arith.mulf %324, %328 : vector<8x32xf32>
    %c0_144 = arith.constant 0 : index
    %c0_145 = arith.constant 0 : index
    %330 = vector.load %arg4[%c0_144, %c0_145] : memref<32x128xf32, #tpu.memory_space<vmem>>, vector<32x128xf32>
    %cst_146 = arith.constant dense<0.000000e+00> : vector<8x128xf32>
    %331 = tpu.matmul %329, %330, %cst_146 {dimension_numbers = #tpu.dot_dimension_numbers<[1], [0], [0], [1], [0, 0, 1, 1], [], []>} : vector<8x32xf32>, vector<32x128xf32>, vector<8x128xf32> -> vector<8x128xf32>
    %332 = arith.addf %331, %303 : vector<8x128xf32>
    %c0_147 = arith.constant 0 : index
    %c0_148 = arith.constant 0 : index
    %333 = vector.load %arg6[%c0_147, %c0_148] : memref<1x128xf32, #tpu.memory_space<vmem>>, vector<1x128xf32>
    %334 = vector.broadcast %333 : vector<1x128xf32> to vector<8x128xf32>
    %335 = arith.addf %332, %334 : vector<8x128xf32>
    %336 = math.tanh %335 : vector<8x128xf32>
    %337 = vector.extract_strided_slice %336 {offsets = [0, 0], sizes = [8, 32], strides = [1, 1]} : vector<8x128xf32> to vector<8x32xf32>
    %cst_149 = arith.constant 5.000000e-01 : f32
    %338 = vector.broadcast %cst_149 : f32 to vector<8x32xf32>
    %339 = arith.mulf %338, %337 : vector<8x32xf32>
    %cst_150 = arith.constant 5.000000e-01 : f32
    %340 = vector.broadcast %cst_150 : f32 to vector<8x32xf32>
    %341 = arith.addf %339, %340 : vector<8x32xf32>
    %342 = vector.extract_strided_slice %336 {offsets = [0, 32], sizes = [8, 32], strides = [1, 1]} : vector<8x128xf32> to vector<8x32xf32>
    %cst_151 = arith.constant 5.000000e-01 : f32
    %343 = vector.broadcast %cst_151 : f32 to vector<8x32xf32>
    %344 = arith.mulf %343, %342 : vector<8x32xf32>
    %cst_152 = arith.constant 5.000000e-01 : f32
    %345 = vector.broadcast %cst_152 : f32 to vector<8x32xf32>
    %346 = arith.addf %344, %345 : vector<8x32xf32>
    %347 = vector.extract_strided_slice %336 {offsets = [0, 64], sizes = [8, 32], strides = [1, 1]} : vector<8x128xf32> to vector<8x32xf32>
    %348 = vector.extract_strided_slice %336 {offsets = [0, 96], sizes = [8, 32], strides = [1, 1]} : vector<8x128xf32> to vector<8x32xf32>
    %cst_153 = arith.constant 5.000000e-01 : f32
    %349 = vector.broadcast %cst_153 : f32 to vector<8x32xf32>
    %350 = arith.mulf %349, %348 : vector<8x32xf32>
    %cst_154 = arith.constant 5.000000e-01 : f32
    %351 = vector.broadcast %cst_154 : f32 to vector<8x32xf32>
    %352 = arith.addf %350, %351 : vector<8x32xf32>
    %353 = arith.mulf %346, %295 : vector<8x32xf32>
    %354 = arith.mulf %341, %347 : vector<8x32xf32>
    %355 = arith.addf %353, %354 : vector<8x32xf32>
    %356 = math.tanh %355 : vector<8x32xf32>
    %357 = arith.mulf %352, %356 : vector<8x32xf32>
    %c5 = arith.constant 5 : index
    %c0_155 = arith.constant 0 : index
    %c0_156 = arith.constant 0 : index
    %358 = vector.load %arg7[%c5, %c0_155, %c0_156] : memref<8x32x4xf32, #tpu.memory_space<vmem>>, vector<1x32x4xf32>
    %359 = vector.shape_cast %358 : vector<1x32x4xf32> to vector<32x4xf32>
    %cst_157 = arith.constant dense<0.000000e+00> : vector<8x4xf32>
    %360 = tpu.matmul %357, %359, %cst_157 {dimension_numbers = #tpu.dot_dimension_numbers<[1], [0], [0], [1], [0, 0, 1, 1], [], []>} : vector<8x32xf32>, vector<32x4xf32>, vector<8x4xf32> -> vector<8x4xf32>
    %361 = arith.addf %301, %360 : vector<8x4xf32>
    %c0_158 = arith.constant 0 : index
    %c0_159 = arith.constant 0 : index
    %362 = vector.load %arg5[%c0_158, %c0_159] : memref<32x128xf32, #tpu.memory_space<vmem>>, vector<32x128xf32>
    %cst_160 = arith.constant dense<0.000000e+00> : vector<8x128xf32>
    %363 = tpu.matmul %357, %362, %cst_160 {dimension_numbers = #tpu.dot_dimension_numbers<[1], [0], [0], [1], [0, 0, 1, 1], [], []>} : vector<8x32xf32>, vector<32x128xf32>, vector<8x128xf32> -> vector<8x128xf32>
    %364 = vector.extract_strided_slice %5 {offsets = [48, 0], sizes = [8, 128], strides = [1, 1]} : vector<64x128xf32> to vector<8x128xf32>
    %c0_161 = arith.constant 0 : index
    %c0_162 = arith.constant 0 : index
    %365 = vector.load %arg3[%c0_161, %c0_162] : memref<32x128xf32, #tpu.memory_space<vmem>>, vector<32x128xf32>
    %cst_163 = arith.constant dense<0.000000e+00> : vector<8x128xf32>
    %366 = tpu.matmul %329, %365, %cst_163 {dimension_numbers = #tpu.dot_dimension_numbers<[1], [0], [0], [1], [0, 0, 1, 1], [], []>} : vector<8x32xf32>, vector<32x128xf32>, vector<8x128xf32> -> vector<8x128xf32>
    %367 = arith.addf %364, %366 : vector<8x128xf32>
    %368 = math.tanh %367 : vector<8x128xf32>
    %369 = vector.extract_strided_slice %368 {offsets = [0, 0], sizes = [8, 32], strides = [1, 1]} : vector<8x128xf32> to vector<8x32xf32>
    %cst_164 = arith.constant 5.000000e-01 : f32
    %370 = vector.broadcast %cst_164 : f32 to vector<8x32xf32>
    %371 = arith.mulf %370, %369 : vector<8x32xf32>
    %cst_165 = arith.constant 5.000000e-01 : f32
    %372 = vector.broadcast %cst_165 : f32 to vector<8x32xf32>
    %373 = arith.addf %371, %372 : vector<8x32xf32>
    %374 = vector.extract_strided_slice %368 {offsets = [0, 32], sizes = [8, 32], strides = [1, 1]} : vector<8x128xf32> to vector<8x32xf32>
    %cst_166 = arith.constant 5.000000e-01 : f32
    %375 = vector.broadcast %cst_166 : f32 to vector<8x32xf32>
    %376 = arith.mulf %375, %374 : vector<8x32xf32>
    %cst_167 = arith.constant 5.000000e-01 : f32
    %377 = vector.broadcast %cst_167 : f32 to vector<8x32xf32>
    %378 = arith.addf %376, %377 : vector<8x32xf32>
    %379 = vector.extract_strided_slice %368 {offsets = [0, 64], sizes = [8, 32], strides = [1, 1]} : vector<8x128xf32> to vector<8x32xf32>
    %380 = vector.extract_strided_slice %368 {offsets = [0, 96], sizes = [8, 32], strides = [1, 1]} : vector<8x128xf32> to vector<8x32xf32>
    %cst_168 = arith.constant 5.000000e-01 : f32
    %381 = vector.broadcast %cst_168 : f32 to vector<8x32xf32>
    %382 = arith.mulf %381, %380 : vector<8x32xf32>
    %cst_169 = arith.constant 5.000000e-01 : f32
    %383 = vector.broadcast %cst_169 : f32 to vector<8x32xf32>
    %384 = arith.addf %382, %383 : vector<8x32xf32>
    %385 = arith.mulf %378, %327 : vector<8x32xf32>
    %386 = arith.mulf %373, %379 : vector<8x32xf32>
    %387 = arith.addf %385, %386 : vector<8x32xf32>
    %388 = math.tanh %387 : vector<8x32xf32>
    %389 = arith.mulf %384, %388 : vector<8x32xf32>
    %c0_170 = arith.constant 0 : index
    %c0_171 = arith.constant 0 : index
    %390 = vector.load %arg4[%c0_170, %c0_171] : memref<32x128xf32, #tpu.memory_space<vmem>>, vector<32x128xf32>
    %cst_172 = arith.constant dense<0.000000e+00> : vector<8x128xf32>
    %391 = tpu.matmul %389, %390, %cst_172 {dimension_numbers = #tpu.dot_dimension_numbers<[1], [0], [0], [1], [0, 0, 1, 1], [], []>} : vector<8x32xf32>, vector<32x128xf32>, vector<8x128xf32> -> vector<8x128xf32>
    %392 = arith.addf %391, %363 : vector<8x128xf32>
    %c0_173 = arith.constant 0 : index
    %c0_174 = arith.constant 0 : index
    %393 = vector.load %arg6[%c0_173, %c0_174] : memref<1x128xf32, #tpu.memory_space<vmem>>, vector<1x128xf32>
    %394 = vector.broadcast %393 : vector<1x128xf32> to vector<8x128xf32>
    %395 = arith.addf %392, %394 : vector<8x128xf32>
    %396 = math.tanh %395 : vector<8x128xf32>
    %397 = vector.extract_strided_slice %396 {offsets = [0, 0], sizes = [8, 32], strides = [1, 1]} : vector<8x128xf32> to vector<8x32xf32>
    %cst_175 = arith.constant 5.000000e-01 : f32
    %398 = vector.broadcast %cst_175 : f32 to vector<8x32xf32>
    %399 = arith.mulf %398, %397 : vector<8x32xf32>
    %cst_176 = arith.constant 5.000000e-01 : f32
    %400 = vector.broadcast %cst_176 : f32 to vector<8x32xf32>
    %401 = arith.addf %399, %400 : vector<8x32xf32>
    %402 = vector.extract_strided_slice %396 {offsets = [0, 32], sizes = [8, 32], strides = [1, 1]} : vector<8x128xf32> to vector<8x32xf32>
    %cst_177 = arith.constant 5.000000e-01 : f32
    %403 = vector.broadcast %cst_177 : f32 to vector<8x32xf32>
    %404 = arith.mulf %403, %402 : vector<8x32xf32>
    %cst_178 = arith.constant 5.000000e-01 : f32
    %405 = vector.broadcast %cst_178 : f32 to vector<8x32xf32>
    %406 = arith.addf %404, %405 : vector<8x32xf32>
    %407 = vector.extract_strided_slice %396 {offsets = [0, 64], sizes = [8, 32], strides = [1, 1]} : vector<8x128xf32> to vector<8x32xf32>
    %408 = vector.extract_strided_slice %396 {offsets = [0, 96], sizes = [8, 32], strides = [1, 1]} : vector<8x128xf32> to vector<8x32xf32>
    %cst_179 = arith.constant 5.000000e-01 : f32
    %409 = vector.broadcast %cst_179 : f32 to vector<8x32xf32>
    %410 = arith.mulf %409, %408 : vector<8x32xf32>
    %cst_180 = arith.constant 5.000000e-01 : f32
    %411 = vector.broadcast %cst_180 : f32 to vector<8x32xf32>
    %412 = arith.addf %410, %411 : vector<8x32xf32>
    %413 = arith.mulf %406, %355 : vector<8x32xf32>
    %414 = arith.mulf %401, %407 : vector<8x32xf32>
    %415 = arith.addf %413, %414 : vector<8x32xf32>
    %416 = math.tanh %415 : vector<8x32xf32>
    %417 = arith.mulf %412, %416 : vector<8x32xf32>
    %c6 = arith.constant 6 : index
    %c0_181 = arith.constant 0 : index
    %c0_182 = arith.constant 0 : index
    %418 = vector.load %arg7[%c6, %c0_181, %c0_182] : memref<8x32x4xf32, #tpu.memory_space<vmem>>, vector<1x32x4xf32>
    %419 = vector.shape_cast %418 : vector<1x32x4xf32> to vector<32x4xf32>
    %cst_183 = arith.constant dense<0.000000e+00> : vector<8x4xf32>
    %420 = tpu.matmul %417, %419, %cst_183 {dimension_numbers = #tpu.dot_dimension_numbers<[1], [0], [0], [1], [0, 0, 1, 1], [], []>} : vector<8x32xf32>, vector<32x4xf32>, vector<8x4xf32> -> vector<8x4xf32>
    %421 = arith.addf %361, %420 : vector<8x4xf32>
    %c0_184 = arith.constant 0 : index
    %c0_185 = arith.constant 0 : index
    %422 = vector.load %arg5[%c0_184, %c0_185] : memref<32x128xf32, #tpu.memory_space<vmem>>, vector<32x128xf32>
    %cst_186 = arith.constant dense<0.000000e+00> : vector<8x128xf32>
    %423 = tpu.matmul %417, %422, %cst_186 {dimension_numbers = #tpu.dot_dimension_numbers<[1], [0], [0], [1], [0, 0, 1, 1], [], []>} : vector<8x32xf32>, vector<32x128xf32>, vector<8x128xf32> -> vector<8x128xf32>
    %424 = vector.extract_strided_slice %5 {offsets = [56, 0], sizes = [8, 128], strides = [1, 1]} : vector<64x128xf32> to vector<8x128xf32>
    %c0_187 = arith.constant 0 : index
    %c0_188 = arith.constant 0 : index
    %425 = vector.load %arg3[%c0_187, %c0_188] : memref<32x128xf32, #tpu.memory_space<vmem>>, vector<32x128xf32>
    %cst_189 = arith.constant dense<0.000000e+00> : vector<8x128xf32>
    %426 = tpu.matmul %389, %425, %cst_189 {dimension_numbers = #tpu.dot_dimension_numbers<[1], [0], [0], [1], [0, 0, 1, 1], [], []>} : vector<8x32xf32>, vector<32x128xf32>, vector<8x128xf32> -> vector<8x128xf32>
    %427 = arith.addf %424, %426 : vector<8x128xf32>
    %428 = math.tanh %427 : vector<8x128xf32>
    %429 = vector.extract_strided_slice %428 {offsets = [0, 0], sizes = [8, 32], strides = [1, 1]} : vector<8x128xf32> to vector<8x32xf32>
    %cst_190 = arith.constant 5.000000e-01 : f32
    %430 = vector.broadcast %cst_190 : f32 to vector<8x32xf32>
    %431 = arith.mulf %430, %429 : vector<8x32xf32>
    %cst_191 = arith.constant 5.000000e-01 : f32
    %432 = vector.broadcast %cst_191 : f32 to vector<8x32xf32>
    %433 = arith.addf %431, %432 : vector<8x32xf32>
    %434 = vector.extract_strided_slice %428 {offsets = [0, 32], sizes = [8, 32], strides = [1, 1]} : vector<8x128xf32> to vector<8x32xf32>
    %cst_192 = arith.constant 5.000000e-01 : f32
    %435 = vector.broadcast %cst_192 : f32 to vector<8x32xf32>
    %436 = arith.mulf %435, %434 : vector<8x32xf32>
    %cst_193 = arith.constant 5.000000e-01 : f32
    %437 = vector.broadcast %cst_193 : f32 to vector<8x32xf32>
    %438 = arith.addf %436, %437 : vector<8x32xf32>
    %439 = vector.extract_strided_slice %428 {offsets = [0, 64], sizes = [8, 32], strides = [1, 1]} : vector<8x128xf32> to vector<8x32xf32>
    %440 = vector.extract_strided_slice %428 {offsets = [0, 96], sizes = [8, 32], strides = [1, 1]} : vector<8x128xf32> to vector<8x32xf32>
    %cst_194 = arith.constant 5.000000e-01 : f32
    %441 = vector.broadcast %cst_194 : f32 to vector<8x32xf32>
    %442 = arith.mulf %441, %440 : vector<8x32xf32>
    %cst_195 = arith.constant 5.000000e-01 : f32
    %443 = vector.broadcast %cst_195 : f32 to vector<8x32xf32>
    %444 = arith.addf %442, %443 : vector<8x32xf32>
    %445 = arith.mulf %438, %387 : vector<8x32xf32>
    %446 = arith.mulf %433, %439 : vector<8x32xf32>
    %447 = arith.addf %445, %446 : vector<8x32xf32>
    %448 = math.tanh %447 : vector<8x32xf32>
    %449 = arith.mulf %444, %448 : vector<8x32xf32>
    %c0_196 = arith.constant 0 : index
    %c0_197 = arith.constant 0 : index
    %450 = vector.load %arg4[%c0_196, %c0_197] : memref<32x128xf32, #tpu.memory_space<vmem>>, vector<32x128xf32>
    %cst_198 = arith.constant dense<0.000000e+00> : vector<8x128xf32>
    %451 = tpu.matmul %449, %450, %cst_198 {dimension_numbers = #tpu.dot_dimension_numbers<[1], [0], [0], [1], [0, 0, 1, 1], [], []>} : vector<8x32xf32>, vector<32x128xf32>, vector<8x128xf32> -> vector<8x128xf32>
    %452 = arith.addf %451, %423 : vector<8x128xf32>
    %c0_199 = arith.constant 0 : index
    %c0_200 = arith.constant 0 : index
    %453 = vector.load %arg6[%c0_199, %c0_200] : memref<1x128xf32, #tpu.memory_space<vmem>>, vector<1x128xf32>
    %454 = vector.broadcast %453 : vector<1x128xf32> to vector<8x128xf32>
    %455 = arith.addf %452, %454 : vector<8x128xf32>
    %456 = math.tanh %455 : vector<8x128xf32>
    %457 = vector.extract_strided_slice %456 {offsets = [0, 0], sizes = [8, 32], strides = [1, 1]} : vector<8x128xf32> to vector<8x32xf32>
    %cst_201 = arith.constant 5.000000e-01 : f32
    %458 = vector.broadcast %cst_201 : f32 to vector<8x32xf32>
    %459 = arith.mulf %458, %457 : vector<8x32xf32>
    %cst_202 = arith.constant 5.000000e-01 : f32
    %460 = vector.broadcast %cst_202 : f32 to vector<8x32xf32>
    %461 = arith.addf %459, %460 : vector<8x32xf32>
    %462 = vector.extract_strided_slice %456 {offsets = [0, 32], sizes = [8, 32], strides = [1, 1]} : vector<8x128xf32> to vector<8x32xf32>
    %cst_203 = arith.constant 5.000000e-01 : f32
    %463 = vector.broadcast %cst_203 : f32 to vector<8x32xf32>
    %464 = arith.mulf %463, %462 : vector<8x32xf32>
    %cst_204 = arith.constant 5.000000e-01 : f32
    %465 = vector.broadcast %cst_204 : f32 to vector<8x32xf32>
    %466 = arith.addf %464, %465 : vector<8x32xf32>
    %467 = vector.extract_strided_slice %456 {offsets = [0, 64], sizes = [8, 32], strides = [1, 1]} : vector<8x128xf32> to vector<8x32xf32>
    %468 = vector.extract_strided_slice %456 {offsets = [0, 96], sizes = [8, 32], strides = [1, 1]} : vector<8x128xf32> to vector<8x32xf32>
    %cst_205 = arith.constant 5.000000e-01 : f32
    %469 = vector.broadcast %cst_205 : f32 to vector<8x32xf32>
    %470 = arith.mulf %469, %468 : vector<8x32xf32>
    %cst_206 = arith.constant 5.000000e-01 : f32
    %471 = vector.broadcast %cst_206 : f32 to vector<8x32xf32>
    %472 = arith.addf %470, %471 : vector<8x32xf32>
    %473 = arith.mulf %466, %415 : vector<8x32xf32>
    %474 = arith.mulf %461, %467 : vector<8x32xf32>
    %475 = arith.addf %473, %474 : vector<8x32xf32>
    %476 = math.tanh %475 : vector<8x32xf32>
    %477 = arith.mulf %472, %476 : vector<8x32xf32>
    %c7 = arith.constant 7 : index
    %c0_207 = arith.constant 0 : index
    %c0_208 = arith.constant 0 : index
    %478 = vector.load %arg7[%c7, %c0_207, %c0_208] : memref<8x32x4xf32, #tpu.memory_space<vmem>>, vector<1x32x4xf32>
    %479 = vector.shape_cast %478 : vector<1x32x4xf32> to vector<32x4xf32>
    %cst_209 = arith.constant dense<0.000000e+00> : vector<8x4xf32>
    %480 = tpu.matmul %477, %479, %cst_209 {dimension_numbers = #tpu.dot_dimension_numbers<[1], [0], [0], [1], [0, 0, 1, 1], [], []>} : vector<8x32xf32>, vector<32x4xf32>, vector<8x4xf32> -> vector<8x4xf32>
    %481 = arith.addf %421, %480 : vector<8x4xf32>
    %c0_210 = arith.constant 0 : index
    %c0_211 = arith.constant 0 : index
    %482 = vector.load %arg8[%c0_210, %c0_211] : memref<1x4xf32, #tpu.memory_space<vmem>>, vector<1x4xf32>
    %483 = vector.broadcast %482 : vector<1x4xf32> to vector<8x4xf32>
    %484 = arith.addf %481, %483 : vector<8x4xf32>
    %485 = math.tanh %484 : vector<8x4xf32>
    %c0_212 = arith.constant 0 : index
    %c0_213 = arith.constant 0 : index
    %486 = vector.load %arg9[%c0_212, %c0_213] : memref<8x4xf32, #tpu.memory_space<vmem>>, vector<8x4xf32>
    tpu.vector_store %arg9[%c0_212, %c0_213], %485 {strides = array<i32>} : memref<8x4xf32, #tpu.memory_space<vmem>>, vector<8x4xf32>,
    %c0_214 = arith.constant 0 : index
    %c0_215 = arith.constant 0 : index
    %c0_216 = arith.constant 0 : index
    %487 = vector.load %arg10[%c0_214, %c0_215, %c0_216] : memref<2x8x32xf32, #tpu.memory_space<vmem>>, vector<1x8x32xf32>
    %488 = vector.shape_cast %487 : vector<1x8x32xf32> to vector<8x32xf32>
    %489 = vector.shape_cast %449 : vector<8x32xf32> to vector<1x8x32xf32>
    tpu.vector_store %arg10[%c0_214, %c0_215, %c0_216], %489 {strides = array<i32>} : memref<2x8x32xf32, #tpu.memory_space<vmem>>, vector<1x8x32xf32>,
    %c1_217 = arith.constant 1 : index
    %c0_218 = arith.constant 0 : index
    %c0_219 = arith.constant 0 : index
    %490 = vector.load %arg10[%c1_217, %c0_218, %c0_219] : memref<2x8x32xf32, #tpu.memory_space<vmem>>, vector<1x8x32xf32>
    %491 = vector.shape_cast %490 : vector<1x8x32xf32> to vector<8x32xf32>
    %492 = vector.shape_cast %477 : vector<8x32xf32> to vector<1x8x32xf32>
    tpu.vector_store %arg10[%c1_217, %c0_218, %c0_219], %492 {strides = array<i32>} : memref<2x8x32xf32, #tpu.memory_space<vmem>>, vector<1x8x32xf32>,
    %c0_220 = arith.constant 0 : index
    %c0_221 = arith.constant 0 : index
    %c0_222 = arith.constant 0 : index
    %493 = vector.load %arg11[%c0_220, %c0_221, %c0_222] : memref<2x8x32xf32, #tpu.memory_space<vmem>>, vector<1x8x32xf32>
    %494 = vector.shape_cast %493 : vector<1x8x32xf32> to vector<8x32xf32>
    %495 = vector.shape_cast %447 : vector<8x32xf32> to vector<1x8x32xf32>
    tpu.vector_store %arg11[%c0_220, %c0_221, %c0_222], %495 {strides = array<i32>} : memref<2x8x32xf32, #tpu.memory_space<vmem>>, vector<1x8x32xf32>,
    %c1_223 = arith.constant 1 : index
    %c0_224 = arith.constant 0 : index
    %c0_225 = arith.constant 0 : index
    %496 = vector.load %arg11[%c1_223, %c0_224, %c0_225] : memref<2x8x32xf32, #tpu.memory_space<vmem>>, vector<1x8x32xf32>
    %497 = vector.shape_cast %496 : vector<1x8x32xf32> to vector<8x32xf32>
    %498 = vector.shape_cast %475 : vector<8x32xf32> to vector<1x8x32xf32>
    tpu.vector_store %arg11[%c1_223, %c0_224, %c0_225], %498 {strides = array<i32>} : memref<2x8x32xf32, #tpu.memory_space<vmem>>, vector<1x8x32xf32>,
    return
  }
}

</mosaic_0001>

<bundles_post_ra>
// kernel: lstm_autoregressive_forward.1
= control target key start
LH: loop header
LB: loop body
LE: loop exit
PB: predicated region body
PF: predicated region fallthrough
CT: control target
= control target key end

     0   :  { %vm76_vm0 = vcmask 1043456   ;;  %vm51_vm1 = vcmask 31744   ;;  %s3463_s25 = smov 32   ;;  %v3464_v18 = vmov 0.0   ;;  %vm3465_vm2 = vmmov 0   ;;  %s4294_s1 = inlined_call_operand.vmem [shape: f32[4,128], index: 1, kind: input, shape index: {}]   ;;  %s4295_s0 = inlined_call_operand.vmem [shape: f32[64,4], index: 0, kind: input, shape index: {}]   ;;  %s4296_s2 = inlined_call_operand.vmem [shape: f32[1,128], index: 2, kind: input, shape index: {}]   ;;  %s4297_s3 = inlined_call_operand.vmem [shape: f32[32,128], index: 3, kind: input, shape index: {}]   ;;  %s4298_s4 = inlined_call_operand.vmem [shape: f32[32,128], index: 4, kind: input, shape index: {}]   ;;  %s4299_s6 = inlined_call_operand.vmem [shape: f32[1,128], index: 6, kind: input, shape index: {}]   ;;  %s4300_s5 = inlined_call_operand.vmem [shape: f32[32,128], index: 5, kind: input, shape index: {}]   ;;  %s4301_s7 = inlined_call_operand.vmem [shape: f32[8,32,4], index: 7, kind: input, shape index: {}]   ;;  %s4302_s10 = inlined_call_operand.vmem [shape: f32[2,8,32], index: 10, kind: output, shape index: {1}]   ;;  %s4303_s11 = inlined_call_operand.vmem [shape: f32[2,8,32], index: 11, kind: output, shape index: {2}]   ;;  %s4304_s8 = inlined_call_operand.vmem [shape: f32[1,4], index: 8, kind: input, shape index: {}]   ;;  %s4305_s9 = inlined_call_operand.vmem [shape: f32[8,4], index: 9, kind: output, shape index: {0}]  }
   0x1   :  { %v43_v0 = vld [vmem:[%s4294_s1] sm:$0xf]  ;;  %v36_v2 = vld [vmem:[%s4295_s0 + $0x8] sm:$0xff]  ;;  %s3462_s1 = smov 64   ;;  %v37_v15 = vld [vmem:[%s4295_s0 + $0x10] sm:$0xff]  ;;  %3047 = vmatprep.subr.mxu1 %v3464_v18  ;;  %3055 = vmatprep.mubr.msk.f32.mxu1 %vm3465_vm2, %v3464_v18  ;;  %vm219_vm3 = vcmask 261120  }
   0x2   :  { %v35_v1 = vld [vmem:[%s4295_s0] sm:$0xff]  ;;  %3033 = vmatprep.subr.msk.mxu0 %vm76_vm0, %v43_v0  ;;  %v38_v16 = vld [vmem:[%s4295_s0 + $0x18] sm:$0xff]  ;;  %v3577_v21 = vld [vmem:[%s4297_s3 + $0x10] sm:$0xff] }
   0x3   :  { %3035 = vmatprep.mubr.msk.f32.mxu0 %vm51_vm1, %v35_v1  ;;  %3034 = vmatpush3.msk.msra.mxu0 %vm76_vm0, %v43_v0  ;;  %v3543_v4 = vld [vmem:[%s4296_s2] ss:$0 sm:$0xff]  ;;  %v3565_v19 = vld [vmem:[%s4297_s3 + $0x18] sm:$0xff]  ;;  %v40_v22 = vld [vmem:[%s4295_s0 + $0x28] sm:$0xff] }
   0x4   :  { %3036 = vmatmul.mubr.msk.f32.vlgmr.msra.gmra.mxu0 %vm51_vm1, %v36_v2  ;;  %v39_v17 = vld [vmem:[%s4295_s0 + $0x20] sm:$0xff]  ;;  %3069 = vmatprep.subr.mxu0 %v3464_v18  ;;  %v3570_v20 = vld [vmem:[%s4298_s4 + $0x18] sm:$0xff]  ;;  %v3587_v23 = vld [vmem:[%s4298_s4 + $0x10] sm:$0xff] }
   0x5   :  { %3038 = vmatprep.mubr.msk.f32.mxu0 %vm51_vm1, %v37_v15  ;;  %3070 = vmatpush3.msra.mxu0 %v3565_v19  ;;  %v41_v24 = vld [vmem:[%s4295_s0 + $0x30] sm:$0xff]  ;;  %v3599_v25 = vld [vmem:[%s4298_s4 + $0x8] sm:$0xff]  ;;  %v42_v27 = vld [vmem:[%s4295_s0 + $0x38] sm:$0xff]  ;;  %s3466_s0 = smov 96  }
   0x6   :  { %3048 = vmatpush3.msra.mxu1 %v3570_v20  ;;  %3071 = vmatprep.subr.mxu0 %v3464_v18  ;;  %v3606_v26 = vld [vmem:[%s4297_s3 + $0x8] sm:$0xff]  ;;  %v3618_v28 = vld [vmem:[%s4298_s4] sm:$0xff]  ;;  %v3679_v0 = vld [vmem:[%s4300_s5 + $0x18] sm:$0xff] }
   0x7   :  { %3049 = vmatprep.subr.mxu1 %v3464_v18  ;;  %3072 = vmatpush3.msra.mxu0 %v3577_v21  ;;  %v3625_v29 = vld [vmem:[%s4297_s3] sm:$0xff]  ;;  %v3684_v1 = vld [vmem:[%s4300_s5 + $0x10] sm:$0xff]  ;;  %v3691_v2 = vld [vmem:[%s4300_s5 + $0x8] sm:$0xff] }
   0x8   :  { %3039 = vmatmul.mubr.msk.f32.gmra.mxu0 %vm51_vm1, %v38_v16  ;;  %3050 = vmatpush3.msra.mxu1 %v3587_v23  ;;  %v3660_v40 = vld [vmem:[%s4299_s6] ss:$0 sm:$0xff]  ;;  %v313_v15 = vld [vmem:[%s4301_s7 + $0x8] sm:$0xff] }
   0x9   :  { %3041 = vmatprep.mubr.msk.f32.mxu0 %vm51_vm1, %v39_v17  ;;  %3051 = vmatprep.subr.mxu1 %v3464_v18  ;;  %v312_v16 = vld [vmem:[%s4301_s7] sm:$0xff] }
   0xa   :  { %3073 = vmatprep.subr.mxu0 %v3464_v18  ;;  %3052 = vmatpush3.msra.mxu1 %v3599_v25 }
   0xb   :  { %3074 = vmatpush3.msra.mxu0 %v3606_v26  ;;  %3053 = vmatprep.subr.mxu1 %v3464_v18 }
   0xc   :  { %3042 = vmatmul.mubr.msk.f32.gmra.mxu0 %vm51_vm1, %v40_v22  ;;  %3075 = vmatprep.subr.mxu0 %v3464_v18 }
   0xd   :  { %3044 = vmatprep.mubr.msk.f32.mxu0 %vm51_vm1, %v41_v24  ;;  %3054 = vmatpush3.msra.mxu1 %v3618_v28 }
   0xe   :  { %3076 = vmatpush3.msra.mxu0 %v3625_v29  ;;  %3058 = vmatprep.subr.mxu1 %v3464_v18 }
   0xf   :  { %3091 = vmatprep.subr.mxu0 %v3464_v18 }
  0x10   :  { %3045 = vmatmul.mubr.msk.f32.gmra.mxu0 %vm51_vm1, %v42_v27 }
  0x11   :  { %3077 = vmatprep.mubr.msk.f32.mxu0 %vm3465_vm2, %v3464_v18 }
  0xc4   :  { %v3538_v3 = vpop.f32.mrf.mxu0 }
  0xc5   :  { %v152_v41 = vadd.f32 %v3538_v3, %v3543_v4  ;;  %v3698_v3 = vld [vmem:[%s4300_s5] sm:$0xff] }
  0xc6   :  { %v146_v5 = vpop.f32.mrf.mxu0 }
  0xc7   :  { %v147_v6 = vadd.f32 %v3543_v4, %v146_v5 }
  0xc8   :  { %v3645_v34 = vpop.f32.mrf.mxu0 }
  0xc9   :  { %3382 = vtanh.f32 %v147_v6 }
  0xca   :  { %v3647_v35 = vpop.f32.mrf.mxu0 }
  0xcc   :  { %v3649_v36 = vpop.f32.mrf.mxu0 }
  0xce   :  { %v3651_v37 = vpop.f32.mrf.mxu0 }
  0xd0   :  { %v3653_v38 = vpop.f32.mrf.mxu0 }
  0xd2   :  { %v3655_v39 = vpop.f32.mrf.mxu0 }
  0xd6   :  { %v3383_v7 = vpop.eup %3382 }
  0xd7   :  { %190 = vrot.lane.b32.xlu0 %v3383_v7, %s3462_s1  ;;  %v186_v8 = vmul.f32 0.5, %v3383_v7 }
  0xd9   :  { %v187_v9 = vadd.f32 0.5, %v186_v8 }
  0xdb   :  { %v188_v12 = vmul.f32 0.0, %v187_v9 }
 0x149   :  { %v191_v10 = vpop.permute.xlu0 %190 }
 0x14a   :  { %v193_v11 = vmul.f32 %v191_v10, %v187_v9 }
 0x14c   :  { %195 = vrot.lane.b32.xlu0 %v193_v11, %s3463_s25 }
 0x1be   :  { %v196_v13 = vpop.permute.xlu0 %195 }
 0x1bf   :  { %v3548_v14 = vadd.f32 %v196_v13, %v188_v12  ;;  %v315_v12 = vld [vmem:[%s4301_s7 + $0x18] sm:$0xff] }
 0x1c1   :  { %3384 = vtanh.f32 %v3548_v14 }
 0x1ce   :  { %v3385_v30 = vpop.eup %3384 }
 0x1cf   :  { %201 = vrot.lane.b32.xlu1 %v3385_v30, %s3462_s1 }
 0x241   :  { %v202_v31 = vpop.permute.xlu1 %201 }
 0x242   :  { %v204_v32 = vmul.f32 %v202_v31, %v187_v9 }
 0x244   :  { %217 = vrot.lane.b32.xlu1 %v204_v32, %s3463_s25 }
 0x2b6   :  { %v218_v33 = vpop.permute.xlu1 %217 }
 0x2b7   :  { %3056 = vmatmul.mubr.msk.f32.vlgmr.msra.gmra.mxu1 %vm219_vm3, %v218_v33  ;;  %3078 = vmatmul.mubr.msk.f32.vlgmr.msra.gmra.mxu0 %vm219_vm3, %v218_v33 }
 0x2b8   :  { %3066 = vmatprep.mubr.msk.f32.mxu1 %vm3465_vm2, %v3464_v18  ;;  %3099 = vmatprep.mubr.msk.f32.mxu0 %vm3465_vm2, %v3464_v18 }
 0x2b9   :  { %3059 = vmatpush3.msra.mxu1 %v3679_v0 }
 0x2ba   :  { %3060 = vmatprep.subr.mxu1 %v3464_v18 }
 0x2bb   :  { %3061 = vmatpush3.msra.mxu1 %v3684_v1 }
 0x2bc   :  { %3062 = vmatprep.subr.mxu1 %v3464_v18 }
 0x2bd   :  { %3063 = vmatpush3.msra.mxu1 %v3691_v2 }
 0x2be   :  { %3064 = vmatprep.subr.mxu1 %v3464_v18 }
 0x2bf   :  { %3065 = vmatpush3.msra.mxu1 %v3698_v3 }
 0x2c0   :  { %3080 = vmatprep.subr.mxu1 %v3464_v18 }
 0x377   :  { %v288_v42 = vpop.f32.mrf.mxu1  ;;  %v465_v43 = vpop.f32.mrf.mxu0 }
 0x378   :  { %v289_v44 = vadd.f32 %v3660_v40, %v288_v42  ;;  %v469_v45 = vadd.f32 %v465_v43, %v152_v41  ;;  %v157_v41 = vadd.f32 %v3543_v4, %v3647_v35 }
 0x379   :  { %v3057_v46 = vpop.f32.mrf.mxu1  ;;  %v3079_v47 = vpop.f32.mrf.mxu0 }
 0x37a   :  { %3386 = vtanh.f32 %v289_v44 }
 0x37b   :  { %3388 = vtanh.f32 %v469_v45 }
 0x387   :  { %v3387_v48 = vpop.eup %3386 }
 0x388   :  { %v3389_v49 = vpop.eup %3388  ;;  %297 = vrot.lane.b32.xlu0 %v3387_v48, %s3462_s1  ;;  %v293_v50 = vmul.f32 0.5, %v3387_v48 }
 0x389   :  { %475 = vrot.lane.b32.xlu1 %v3389_v49, %s3462_s1  ;;  %v471_v51 = vmul.f32 0.5, %v3389_v49 }
 0x38a   :  { %v294_v52 = vadd.f32 0.5, %v293_v50 }
 0x38b   :  { %v472_v53 = vadd.f32 0.5, %v471_v51 }
 0x38c   :  { %v295_v58 = vmul.f32 0.0, %v294_v52 }
 0x38d   :  { %v473_v59 = vmul.f32 %v472_v53, %v3548_v14  ;;  %v314_v14 = vld [vmem:[%s4301_s7 + $0x10] sm:$0xff] }
 0x3fa   :  { %v298_v54 = vpop.permute.xlu0 %297 }
 0x3fb   :  { %v476_v55 = vpop.permute.xlu1 %475  ;;  %v300_v56 = vmul.f32 %v298_v54, %v294_v52 }
 0x3fc   :  { %v478_v57 = vmul.f32 %v476_v55, %v472_v53 }
 0x3fd   :  { %302 = vrot.lane.b32.xlu0 %v300_v56, %s3463_s25 }
 0x3fe   :  { %480 = vrot.lane.b32.xlu1 %v478_v57, %s3463_s25 }
 0x46f   :  { %v303_v60 = vpop.permute.xlu0 %302 }
 0x470   :  { %v481_v61 = vpop.permute.xlu1 %480  ;;  %v3670_v62 = vadd.f32 %v303_v60, %v295_v58 }
 0x471   :  { %v3672_v63 = vadd.f32 %v481_v61, %v473_v59  ;;  %v2820_v61 = vld [vmem:[%s4301_s7 + $0x38] sm:$0xff] }
 0x472   :  { %3390 = vtanh.f32 %v3670_v62  ;;  %3092 = vmatpush3.msra.mxu0 %v2820_v61 }
 0x473   :  { %3392 = vtanh.f32 %v3672_v63  ;;  %3093 = vmatprep.subr.mxu0 %v3464_v18 }
 0x47f   :  { %v3391_v5 = vpop.eup %3390 }
 0x480   :  { %v3393_v6 = vpop.eup %3392  ;;  %308 = vrot.lane.b32.xlu0 %v3391_v5, %s3462_s1  ;;  %v2817_v5 = vld [vmem:[%s4301_s7 + $0x20] sm:$0xff] }
 0x481   :  { %486 = vrot.lane.b32.xlu1 %v3393_v6, %s3462_s1 }
 0x4f2   :  { %v309_v7 = vpop.permute.xlu0 %308 }
 0x4f3   :  { %v487_v8 = vpop.permute.xlu1 %486  ;;  %v311_v9 = vmul.f32 %v309_v7, %v294_v52 }
 0x4f4   :  { %v489_v10 = vmul.f32 %v487_v8, %v472_v53 }
 0x4f5   :  { %321 = vrot.lane.b32.xlu0 %v311_v9, %s3463_s25 }
 0x4f6   :  { %491 = vrot.lane.b32.xlu1 %v489_v10, %s3463_s25 }
 0x567   :  { %v322_v11 = vpop.permute.xlu0 %321 }
 0x568   :  { %3067 = vmatmul.mubr.msk.f32.vlgmr.msra.gmra.mxu1 %vm219_vm3, %v322_v11  ;;  %v492_v13 = vpop.permute.xlu1 %491 }
 0x569   :  { %3081 = vmatpush3.msra.mxu1 %v3570_v20  ;;  %3088 = vmatprep.mubr.msk.f32.mxu1 %vm3465_vm2, %v3464_v18 }
 0x56a   :  { %3082 = vmatprep.subr.mxu1 %v3464_v18 }
 0x56b   :  { %3083 = vmatpush3.msra.mxu1 %v3587_v23 }
 0x56c   :  { %3084 = vmatprep.subr.mxu1 %v3464_v18 }
 0x56d   :  { %3085 = vmatpush3.msra.mxu1 %v3599_v25 }
 0x56e   :  { %3086 = vmatprep.subr.mxu1 %v3464_v18 }
 0x56f   :  { %3087 = vmatpush3.msra.mxu1 %v3618_v28 }
 0x570   :  { %3089 = vmatmul.mubr.msk.f32.vlgmr.msra.gmra.mxu1 %vm219_vm3, %v492_v13  ;;  %3102 = vmatprep.subr.mxu1 %v3464_v18 }
 0x571   :  { %3103 = vmatpush3.msra.mxu1 %v315_v12  ;;  %3110 = vmatprep.mubr.msk.f32.mxu1 %vm3465_vm2, %v3464_v18 }
 0x572   :  { %3104 = vmatprep.subr.mxu1 %v3464_v18 }
 0x573   :  { %3105 = vmatpush3.msra.mxu1 %v314_v14 }
 0x574   :  { %3106 = vmatprep.subr.mxu1 %v3464_v18 }
 0x575   :  { %3107 = vmatpush3.msra.mxu1 %v313_v15 }
 0x576   :  { %3108 = vmatprep.subr.mxu1 %v3464_v18 }
 0x577   :  { %3109 = vmatpush3.msra.mxu1 %v312_v16 }
 0x578   :  { %3111 = vmatmul.mubr.msk.f32.vlgmr.msra.gmra.mxu1 %vm219_vm3, %v322_v11  ;;  %3124 = vmatprep.subr.mxu1 %v3464_v18 }
 0x579   :  { %3125 = vmatpush3.msra.mxu1 %v3565_v19  ;;  %3132 = vmatprep.mubr.msk.f32.mxu1 %vm3465_vm2, %v3464_v18 }
 0x57a   :  { %3126 = vmatprep.subr.mxu1 %v3464_v18 }
 0x57b   :  { %3127 = vmatpush3.msra.mxu1 %v3577_v21 }
 0x57c   :  { %3128 = vmatprep.subr.mxu1 %v3464_v18 }
 0x57d   :  { %3129 = vmatpush3.msra.mxu1 %v3606_v26 }
 0x57e   :  { %3130 = vmatprep.subr.mxu1 %v3464_v18 }
 0x57f   :  { %3131 = vmatpush3.msra.mxu1 %v3625_v29 }
 0x580   :  { %3133 = vmatmul.mubr.msk.f32.vlgmr.msra.gmra.mxu1 %vm219_vm3, %v492_v13  ;;  %3146 = vmatprep.subr.mxu1 %v3464_v18 }
 0x581   :  { %3154 = vmatprep.mubr.msk.f32.mxu1 %vm3465_vm2, %v3464_v18 }
 0x628   :  { %v391_v17 = vpop.f32.mrf.mxu1 }
 0x62a   :  { %v3068_v22 = vpop.f32.mrf.mxu1 }
 0x630   :  { %v561_v24 = vpop.f32.mrf.mxu1 }
 0x631   :  { %v562_v27 = vadd.f32 %v561_v24, %v391_v17 }
 0x632   :  { %v3090_v30 = vpop.f32.mrf.mxu1 }
 0x633   :  { %v565_v31 = vadd.f32 %v3660_v40, %v562_v27 }
 0x635   :  { %3394 = vtanh.f32 %v565_v31 }
 0x638   :  { %v3753_v32 = vpop.f32.mrf.mxu1 }
 0x63a   :  { %v3112_v33 = vpop.f32.mrf.mxu1 }
 0x640   :  { %v872_v42 = vpop.f32.mrf.mxu1 }
 0x641   :  { %v876_v43 = vadd.f32 %v872_v42, %v157_v41 }
 0x642   :  { %v3395_v44 = vpop.eup %3394  ;;  %v3134_v45 = vpop.f32.mrf.mxu1 }
 0x643   :  { %3396 = vtanh.f32 %v876_v43  ;;  %571 = vrot.lane.b32.xlu0 %v3395_v44, %s3462_s1  ;;  %v567_v47 = vmul.f32 0.5, %v3395_v44 }
 0x645   :  { %v568_v48 = vadd.f32 0.5, %v567_v47  ;;  %v2828_v47 = vld [vmem:[%s4301_s7 + $0x50] sm:$0xff] }
 0x647   :  { %v569_v54 = vmul.f32 %v568_v48, %v3670_v62  ;;  %v2819_v62 = vld [vmem:[%s4301_s7 + $0x30] sm:$0xff] }
 0x648   :  { %3094 = vmatpush3.msra.mxu0 %v2819_v62 }
 0x649   :  { %3095 = vmatprep.subr.mxu0 %v3464_v18 }
 0x650   :  { %v3397_v46 = vpop.eup %3396 }
 0x651   :  { %882 = vrot.lane.b32.xlu1 %v3397_v46, %s3462_s1  ;;  %v878_v51 = vmul.f32 0.5, %v3397_v46  ;;  %v2829_v46 = vld [vmem:[%s4301_s7 + $0x58] sm:$0xff] }
 0x652   :  { %3147 = vmatpush3.msra.mxu1 %v2829_v46  ;;  %v2834_v46 = vld [vmem:[%s4301_s7 + $0x60] sm:$0xff] }
 0x653   :  { %v879_v52 = vadd.f32 0.5, %v878_v51  ;;  %3148 = vmatprep.subr.mxu1 %v3464_v18 }
 0x654   :  { %3149 = vmatpush3.msra.mxu1 %v2828_v47 }
 0x655   :  { %v880_v57 = vmul.f32 %v879_v52, %v3672_v63  ;;  %v2818_v63 = vld [vmem:[%s4301_s7 + $0x28] sm:$0xff]  ;;  %3150 = vmatprep.subr.mxu1 %v3464_v18 }
 0x656   :  { %3096 = vmatpush3.msra.mxu0 %v2818_v63 }
 0x657   :  { %3097 = vmatprep.subr.mxu0 %v3464_v18 }
 0x658   :  { %3098 = vmatpush3.msra.mxu0 %v2817_v5 }
 0x659   :  { %3113 = vmatprep.subr.mxu0 %v3464_v18 }
 0x6b5   :  { %v572_v49 = vpop.permute.xlu0 %571 }
 0x6b6   :  { %v574_v50 = vmul.f32 %v572_v49, %v568_v48  ;;  %v2826_v49 = vld [vmem:[%s4301_s7 + $0x40] sm:$0xff] }
 0x6b8   :  { %576 = vrot.lane.b32.xlu0 %v574_v50, %s3463_s25 }
 0x6c3   :  { %v883_v53 = vpop.permute.xlu1 %882 }
 0x6c4   :  { %v885_v35 = vmul.f32 %v883_v53, %v879_v52 }
 0x6c6   :  { %887 = vrot.lane.b32.xlu1 %v885_v35, %s3463_s25 }
 0x72a   :  { %v577_v55 = vpop.permute.xlu0 %576 }
 0x72b   :  { %v3762_v56 = vadd.f32 %v577_v55, %v569_v54 }
 0x72d   :  { %3398 = vtanh.f32 %v3762_v56 }
 0x738   :  { %v888_v58 = vpop.permute.xlu1 %887 }
 0x739   :  { %v3766_v59 = vadd.f32 %v888_v58, %v880_v57 }
 0x73a   :  { %v3399_v60 = vpop.eup %3398 }
 0x73b   :  { %3400 = vtanh.f32 %v3766_v59  ;;  %582 = vrot.lane.b32.xlu0 %v3399_v60, %s3462_s1  ;;  %v162_v60 = vadd.f32 %v3645_v34, %v3543_v4 }
 0x748   :  { %v3401_v6 = vpop.eup %3400 }
 0x749   :  { %893 = vrot.lane.b32.xlu1 %v3401_v6, %s3462_s1 }
 0x7ad   :  { %v583_v7 = vpop.permute.xlu0 %582 }
 0x7ae   :  { %v585_v8 = vmul.f32 %v583_v7, %v568_v48  ;;  %v2827_v48 = vld [vmem:[%s4301_s7 + $0x48] sm:$0xff] }
 0x7af   :  { %3151 = vmatpush3.msra.mxu1 %v2827_v48 }
 0x7b0   :  { %592 = vrot.lane.b32.xlu0 %v585_v8, %s3463_s25  ;;  %3152 = vmatprep.subr.mxu1 %v3464_v18 }
 0x7b1   :  { %3153 = vmatpush3.msra.mxu1 %v2826_v49 }
 0x7b2   :  { %3168 = vmatprep.subr.mxu1 %v3464_v18 }
 0x7bb   :  { %v894_v9 = vpop.permute.xlu1 %893 }
 0x7bc   :  { %v896_v10 = vmul.f32 %v894_v9, %v879_v52 }
 0x7be   :  { %898 = vrot.lane.b32.xlu1 %v896_v10, %s3463_s25 }
 0x822   :  { %v593_v11 = vpop.permute.xlu0 %592 }
 0x823   :  { %3100 = vmatmul.mubr.msk.f32.vlgmr.msra.gmra.mxu0 %vm219_vm3, %v593_v11 }
 0x824   :  { %3114 = vmatpush3.msra.mxu0 %v3679_v0  ;;  %3121 = vmatprep.mubr.msk.f32.mxu0 %vm3465_vm2, %v3464_v18 }
 0x825   :  { %3115 = vmatprep.subr.mxu0 %v3464_v18 }
 0x826   :  { %3116 = vmatpush3.msra.mxu0 %v3684_v1 }
 0x827   :  { %3117 = vmatprep.subr.mxu0 %v3464_v18 }
 0x828   :  { %3118 = vmatpush3.msra.mxu0 %v3691_v2 }
 0x829   :  { %3119 = vmatprep.subr.mxu0 %v3464_v18 }
 0x82a   :  { %3120 = vmatpush3.msra.mxu0 %v3698_v3 }
 0x82b   :  { %3122 = vmatmul.mubr.msk.f32.vlgmr.msra.gmra.mxu0 %vm219_vm3, %v593_v11  ;;  %3135 = vmatprep.subr.mxu0 %v3464_v18 }
 0x82c   :  { %3136 = vmatpush3.msra.mxu0 %v3570_v20  ;;  %3143 = vmatprep.mubr.msk.f32.mxu0 %vm3465_vm2, %v3464_v18 }
 0x82d   :  { %3137 = vmatprep.subr.mxu0 %v3464_v18 }
 0x82e   :  { %3138 = vmatpush3.msra.mxu0 %v3587_v23 }
 0x82f   :  { %3139 = vmatprep.subr.mxu0 %v3464_v18 }
 0x830   :  { %3140 = vmatpush3.msra.mxu0 %v3599_v25  ;;  %v3808_v12 = vpop.permute.xlu1 %898 }
 0x831   :  { %3141 = vmatprep.subr.mxu0 %v3464_v18 }
 0x832   :  { %3142 = vmatpush3.msra.mxu0 %v3618_v28 }
 0x833   :  { %3144 = vmatmul.mubr.msk.f32.vlgmr.msra.gmra.mxu0 %vm219_vm3, %v3808_v12  ;;  %3157 = vmatprep.subr.mxu0 %v3464_v18 }
 0x834   :  { %3158 = vmatpush3.msra.mxu0 %v3679_v0  ;;  %3165 = vmatprep.mubr.msk.f32.mxu0 %vm3465_vm2, %v3464_v18 }
 0x835   :  { %3159 = vmatprep.subr.mxu0 %v3464_v18 }
 0x836   :  { %3160 = vmatpush3.msra.mxu0 %v3684_v1 }
 0x837   :  { %3161 = vmatprep.subr.mxu0 %v3464_v18 }
 0x838   :  { %3162 = vmatpush3.msra.mxu0 %v3691_v2 }
 0x839   :  { %3163 = vmatprep.subr.mxu0 %v3464_v18 }
 0x83a   :  { %3164 = vmatpush3.msra.mxu0 %v3698_v3 }
 0x83b   :  { %3179 = vmatprep.subr.mxu0 %v3464_v18 }
 0x8e3   :  { %v662_v13 = vpop.f32.mrf.mxu0 }
 0x8e4   :  { %v733_v35 = vadd.f32 %v3753_v32, %v662_v13 }
 0x8e5   :  { %v3101_v14 = vpop.f32.mrf.mxu0 }
 0x8eb   :  { %v802_v15 = vpop.f32.mrf.mxu0 }
 0x8ed   :  { %v3123_v16 = vpop.f32.mrf.mxu0 }
 0x8f3   :  { %v968_v17 = vpop.f32.mrf.mxu0 }
 0x8f4   :  { %v969_v22 = vadd.f32 %v968_v17, %v802_v15 }
 0x8f5   :  { %v3145_v24 = vpop.f32.mrf.mxu0 }
 0x8f6   :  { %v972_v27 = vadd.f32 %v3660_v40, %v969_v22 }
 0x8f8   :  { %3402 = vtanh.f32 %v972_v27 }
 0x905   :  { %v3403_v30 = vpop.eup %3402 }
 0x906   :  { %978 = vrot.lane.b32.xlu0 %v3403_v30, %s3462_s1  ;;  %v974_v31 = vmul.f32 0.5, %v3403_v30 }
 0x908   :  { %v975_v33 = vadd.f32 0.5, %v974_v31 }
 0x90a   :  { %v976_v43 = vmul.f32 %v975_v33, %v3762_v56 }
 0x978   :  { %v979_v41 = vpop.permute.xlu0 %978 }
 0x979   :  { %v981_v42 = vmul.f32 %v979_v41, %v975_v33 }
 0x97b   :  { %983 = vrot.lane.b32.xlu1 %v981_v42, %s3463_s25 }
 0x9ed   :  { %v984_v44 = vpop.permute.xlu1 %983 }
 0x9ee   :  { %v3829_v45 = vadd.f32 %v984_v44, %v976_v43  ;;  %v2837_v43 = vld [vmem:[%s4301_s7 + $0x78] sm:$0xff]  ;;  %v2836_v44 = vld [vmem:[%s4301_s7 + $0x70] sm:$0xff] }
 0x9f0   :  { %3404 = vtanh.f32 %v3829_v45 }
 0x9fd   :  { %v3405_v50 = vpop.eup %3404 }
 0x9fe   :  { %989 = vrot.lane.b32.xlu0 %v3405_v50, %s3462_s1 }
 0xa70   :  { %v990_v51 = vpop.permute.xlu0 %989 }
 0xa71   :  { %v992_v52 = vmul.f32 %v990_v51, %v975_v33 }
 0xa73   :  { %999 = vrot.lane.b32.xlu1 %v992_v52, %s3463_s25 }
 0xae5   :  { %v1000_v53 = vpop.permute.xlu1 %999 }
 0xae6   :  { %3155 = vmatmul.mubr.msk.f32.vlgmr.msra.gmra.mxu1 %vm219_vm3, %v1000_v53  ;;  %3166 = vmatmul.mubr.msk.f32.vlgmr.msra.gmra.mxu0 %vm219_vm3, %v1000_v53 }
 0xae7   :  { %3169 = vmatpush3.msra.mxu1 %v3565_v19  ;;  %3176 = vmatprep.mubr.msk.f32.mxu1 %vm3465_vm2, %v3464_v18 }
 0xae8   :  { %3170 = vmatprep.subr.mxu1 %v3464_v18  ;;  %3180 = vmatpush3.msra.mxu0 %v3570_v20 }
 0xae9   :  { %3171 = vmatpush3.msra.mxu1 %v3577_v21  ;;  %3181 = vmatprep.subr.mxu0 %v3464_v18 }
 0xaea   :  { %3172 = vmatprep.subr.mxu1 %v3464_v18  ;;  %3182 = vmatpush3.msra.mxu0 %v3587_v23 }
 0xaeb   :  { %3173 = vmatpush3.msra.mxu1 %v3606_v26  ;;  %3183 = vmatprep.subr.mxu0 %v3464_v18 }
 0xaec   :  { %3174 = vmatprep.subr.mxu1 %v3464_v18  ;;  %3184 = vmatpush3.msra.mxu0 %v3599_v25 }
 0xaed   :  { %3175 = vmatpush3.msra.mxu1 %v3625_v29  ;;  %3185 = vmatprep.subr.mxu0 %v3464_v18 }
 0xaee   :  { %3177 = vmatmul.mubr.msk.f32.vlgmr.msra.gmra.mxu1 %vm219_vm3, %v3808_v12  ;;  %3186 = vmatpush3.msra.mxu0 %v3618_v28 }
 0xaef   :  { %3187 = vmatprep.mubr.msk.f32.mxu0 %vm3465_vm2, %v3464_v18  ;;  %3190 = vmatprep.subr.mxu1 %v3464_v18 }
 0xaf0   :  { %3201 = vmatprep.subr.mxu0 %v3464_v18  ;;  %3198 = vmatprep.mubr.msk.f32.mxu1 %vm3465_vm2, %v3464_v18 }
 0xaf1   :  { %3191 = vmatpush3.msra.mxu1 %v2837_v43 }
 0xaf2   :  { %3192 = vmatprep.subr.mxu1 %v3464_v18 }
 0xaf3   :  { %3193 = vmatpush3.msra.mxu1 %v2836_v44 }
 0xaf4   :  { %3194 = vmatprep.subr.mxu1 %v3464_v18 }
 0xba6   :  { %v1069_v54 = vpop.f32.mrf.mxu1  ;;  %v1140_v55 = vpop.f32.mrf.mxu0 }
 0xba7   :  { %v3877_v56 = vadd.f32 %v1069_v54, %v733_v35 }
 0xba8   :  { %v3156_v57 = vpop.f32.mrf.mxu1  ;;  %v3167_v58 = vpop.f32.mrf.mxu0 }
 0xbae   :  { %v1210_v61 = vpop.f32.mrf.mxu1 }
 0xbaf   :  { %v1214_v62 = vadd.f32 %v1210_v61, %v162_v60 }
 0xbb0   :  { %v3178_v63 = vpop.f32.mrf.mxu1 }
 0xbb1   :  { %3406 = vtanh.f32 %v1214_v62 }
 0xbbe   :  { %v3407_v5 = vpop.eup %3406 }
 0xbbf   :  { %1220 = vrot.lane.b32.xlu0 %v3407_v5, %s3462_s1  ;;  %v1216_v6 = vmul.f32 0.5, %v3407_v5 }
 0xbc1   :  { %v1217_v7 = vadd.f32 0.5, %v1216_v6 }
 0xbc3   :  { %v1218_v9 = vmul.f32 %v1217_v7, %v3766_v59 }
 0xc31   :  { %v1221_v8 = vpop.permute.xlu0 %1220 }
 0xc32   :  { %v1223_v32 = vmul.f32 %v1221_v8, %v1217_v7 }
 0xc34   :  { %1225 = vrot.lane.b32.xlu1 %v1223_v32, %s3463_s25 }
 0xca6   :  { %v1226_v10 = vpop.permute.xlu1 %1225 }
 0xca7   :  { %v3884_v11 = vadd.f32 %v1226_v10, %v1218_v9 }
 0xca9   :  { %3408 = vtanh.f32 %v3884_v11 }
 0xcb6   :  { %v3409_v34 = vpop.eup %3408 }
 0xcb7   :  { %1231 = vrot.lane.b32.xlu0 %v3409_v34, %s3462_s1 }
 0xd29   :  { %v1232_v12 = vpop.permute.xlu0 %1231 }
 0xd2a   :  { %v1234_v13 = vmul.f32 %v1232_v12, %v1217_v7 }
 0xd2c   :  { %1236 = vrot.lane.b32.xlu1 %v1234_v13, %s3463_s25 }
 0xd9e   :  { %v1237_v14 = vpop.permute.xlu1 %1236 }
 0xd9f   :  { %3188 = vmatmul.mubr.msk.f32.vlgmr.msra.gmra.mxu0 %vm219_vm3, %v1237_v14 }
 0xda0   :  { %3202 = vmatpush3.msra.mxu0 %v3679_v0  ;;  %3209 = vmatprep.mubr.msk.f32.mxu0 %vm3465_vm2, %v3464_v18 }
 0xda1   :  { %3203 = vmatprep.subr.mxu0 %v3464_v18 }
 0xda2   :  { %3204 = vmatpush3.msra.mxu0 %v3684_v1 }
 0xda3   :  { %3205 = vmatprep.subr.mxu0 %v3464_v18 }
 0xda4   :  { %3206 = vmatpush3.msra.mxu0 %v3691_v2 }
 0xda5   :  { %3207 = vmatprep.subr.mxu0 %v3464_v18 }
 0xda6   :  { %3208 = vmatpush3.msra.mxu0 %v3698_v3 }
 0xda7   :  { %3223 = vmatprep.subr.mxu0 %v3464_v18 }
 0xe5f   :  { %v1306_v59 = vpop.f32.mrf.mxu0 }
 0xe60   :  { %v1307_v15 = vadd.f32 %v1306_v59, %v1140_v55  ;;  %v167_v55 = vadd.f32 %v3543_v4, %v3651_v37 }
 0xe61   :  { %v3189_v16 = vpop.f32.mrf.mxu0 }
 0xe62   :  { %v1310_v17 = vadd.f32 %v3660_v40, %v1307_v15 }
 0xe64   :  { %3410 = vtanh.f32 %v1310_v17 }
 0xe71   :  { %v3411_v22 = vpop.eup %3410 }
 0xe72   :  { %1316 = vrot.lane.b32.xlu0 %v3411_v22, %s3462_s1  ;;  %v1312_v24 = vmul.f32 0.5, %v3411_v22 }
 0xe74   :  { %v1313_v27 = vadd.f32 0.5, %v1312_v24 }
 0xe76   :  { %v1314_v33 = vmul.f32 %v1313_v27, %v3829_v45  ;;  %v2835_v45 = vld [vmem:[%s4301_s7 + $0x68] sm:$0xff] }
 0xe77   :  { %3195 = vmatpush3.msra.mxu1 %v2835_v45 }
 0xe78   :  { %3196 = vmatprep.subr.mxu1 %v3464_v18 }
 0xe79   :  { %3197 = vmatpush3.msra.mxu1 %v2834_v46 }
 0xe7a   :  { %3212 = vmatprep.subr.mxu1 %v3464_v18 }
 0xee4   :  { %v1317_v30 = vpop.permute.xlu0 %1316 }
 0xee5   :  { %v1319_v31 = vmul.f32 %v1317_v30, %v1313_v27  ;;  %v2844_v30 = vld [vmem:[%s4301_s7 + $0x90] sm:$0xff] }
 0xee7   :  { %1321 = vrot.lane.b32.xlu1 %v1319_v31, %s3463_s25  ;;  %v2843_v31 = vld [vmem:[%s4301_s7 + $0x88] sm:$0xff] }
 0xf59   :  { %v1322_v41 = vpop.permute.xlu1 %1321 }
 0xf5a   :  { %v3904_v42 = vadd.f32 %v1322_v41, %v1314_v33  ;;  %v2842_v33 = vld [vmem:[%s4301_s7 + $0x80] sm:$0xff] }
 0xf5c   :  { %3412 = vtanh.f32 %v3904_v42 }
 0xf69   :  { %v3413_v47 = vpop.eup %3412 }
 0xf6a   :  { %1327 = vrot.lane.b32.xlu0 %v3413_v47, %s3462_s1 }
 0xfdc   :  { %v1328_v48 = vpop.permute.xlu0 %1327 }
 0xfdd   :  { %v1330_v49 = vmul.f32 %v1328_v48, %v1313_v27  ;;  %v2845_v27 = vld [vmem:[%s4301_s7 + $0x98] sm:$0xff] }
 0xfdf   :  { %1337 = vrot.lane.b32.xlu1 %v1330_v49, %s3463_s25 }
0x1051   :  { %v1338_v50 = vpop.permute.xlu1 %1337 }
0x1052   :  { %3199 = vmatmul.mubr.msk.f32.vlgmr.msra.gmra.mxu1 %vm219_vm3, %v1338_v50  ;;  %3210 = vmatmul.mubr.msk.f32.vlgmr.msra.gmra.mxu0 %vm219_vm3, %v1338_v50 }
0x1053   :  { %3213 = vmatpush3.msra.mxu1 %v3565_v19  ;;  %3220 = vmatprep.mubr.msk.f32.mxu1 %vm3465_vm2, %v3464_v18 }
0x1054   :  { %3214 = vmatprep.subr.mxu1 %v3464_v18  ;;  %3224 = vmatpush3.msra.mxu0 %v3570_v20 }
0x1055   :  { %3215 = vmatpush3.msra.mxu1 %v3577_v21  ;;  %3225 = vmatprep.subr.mxu0 %v3464_v18 }
0x1056   :  { %3216 = vmatprep.subr.mxu1 %v3464_v18  ;;  %3226 = vmatpush3.msra.mxu0 %v3587_v23 }
0x1057   :  { %3217 = vmatpush3.msra.mxu1 %v3606_v26  ;;  %3227 = vmatprep.subr.mxu0 %v3464_v18 }
0x1058   :  { %3218 = vmatprep.subr.mxu1 %v3464_v18  ;;  %3228 = vmatpush3.msra.mxu0 %v3599_v25 }
0x1059   :  { %3219 = vmatpush3.msra.mxu1 %v3625_v29  ;;  %3229 = vmatprep.subr.mxu0 %v3464_v18 }
0x105a   :  { %3221 = vmatmul.mubr.msk.f32.vlgmr.msra.gmra.mxu1 %vm219_vm3, %v1237_v14  ;;  %3230 = vmatpush3.msra.mxu0 %v3618_v28 }
0x105b   :  { %3231 = vmatprep.mubr.msk.f32.mxu0 %vm3465_vm2, %v3464_v18  ;;  %3234 = vmatprep.subr.mxu1 %v3464_v18 }
0x105c   :  { %3245 = vmatprep.subr.mxu0 %v3464_v18  ;;  %3242 = vmatprep.mubr.msk.f32.mxu1 %vm3465_vm2, %v3464_v18 }
0x105d   :  { %3235 = vmatpush3.msra.mxu1 %v2845_v27 }
0x105e   :  { %3236 = vmatprep.subr.mxu1 %v3464_v18 }
0x105f   :  { %3237 = vmatpush3.msra.mxu1 %v2844_v30 }
0x1060   :  { %3238 = vmatprep.subr.mxu1 %v3464_v18 }
0x1061   :  { %3239 = vmatpush3.msra.mxu1 %v2843_v31 }
0x1062   :  { %3240 = vmatprep.subr.mxu1 %v3464_v18 }
0x1063   :  { %3241 = vmatpush3.msra.mxu1 %v2842_v33 }
0x1064   :  { %3256 = vmatprep.subr.mxu1 %v3464_v18 }
0x1112   :  { %v1407_v51 = vpop.f32.mrf.mxu1  ;;  %v1478_v52 = vpop.f32.mrf.mxu0 }
0x1113   :  { %v3951_v53 = vadd.f32 %v1407_v51, %v3877_v56 }
0x1114   :  { %v3200_v35 = vpop.f32.mrf.mxu1  ;;  %v3211_v54 = vpop.f32.mrf.mxu0 }
0x111a   :  { %v1548_v57 = vpop.f32.mrf.mxu1 }
0x111b   :  { %v1552_v58 = vadd.f32 %v1548_v57, %v167_v55 }
0x111c   :  { %v3222_v60 = vpop.f32.mrf.mxu1 }
0x111d   :  { %3414 = vtanh.f32 %v1552_v58 }
0x112a   :  { %v3415_v61 = vpop.eup %3414 }
0x112b   :  { %1558 = vrot.lane.b32.xlu0 %v3415_v61, %s3462_s1  ;;  %v1554_v62 = vmul.f32 0.5, %v3415_v61 }
0x112d   :  { %v1555_v63 = vadd.f32 0.5, %v1554_v62 }
0x112f   :  { %v1556_v56 = vmul.f32 %v1555_v63, %v3884_v11 }
0x119d   :  { %v1559_v5 = vpop.permute.xlu0 %1558 }
0x119e   :  { %v1561_v6 = vmul.f32 %v1559_v5, %v1555_v63 }
0x11a0   :  { %1563 = vrot.lane.b32.xlu1 %v1561_v6, %s3463_s25 }
0x1212   :  { %v1564_v7 = vpop.permute.xlu1 %1563 }
0x1213   :  { %v3958_v8 = vadd.f32 %v1564_v7, %v1556_v56  ;;  %v2852_v7 = vld [vmem:[%s4301_s7 + $0xb0] sm:$0xff] }
0x1215   :  { %3416 = vtanh.f32 %v3958_v8 }
0x1222   :  { %v3417_v4 = vpop.eup %3416 }
0x1223   :  { %1569 = vrot.lane.b32.xlu0 %v3417_v4, %s3462_s1  ;;  %v2850_v4 = vld [vmem:[%s4301_s7 + $0xa0] sm:$0xff] }
0x1295   :  { %v1570_v37 = vpop.permute.xlu0 %1569 }
0x1296   :  { %v1572_v32 = vmul.f32 %v1570_v37, %v1555_v63 }
0x1298   :  { %1574 = vrot.lane.b32.xlu1 %v1572_v32, %s3463_s25 }
0x130a   :  { %v1575_v9 = vpop.permute.xlu1 %1574 }
0x130b   :  { %3232 = vmatmul.mubr.msk.f32.vlgmr.msra.gmra.mxu0 %vm219_vm3, %v1575_v9 }
0x130c   :  { %3246 = vmatpush3.msra.mxu0 %v3679_v0  ;;  %3253 = vmatprep.mubr.msk.f32.mxu0 %vm3465_vm2, %v3464_v18 }
0x130d   :  { %3247 = vmatprep.subr.mxu0 %v3464_v18 }
0x130e   :  { %3248 = vmatpush3.msra.mxu0 %v3684_v1 }
0x130f   :  { %3249 = vmatprep.subr.mxu0 %v3464_v18 }
0x1310   :  { %3250 = vmatpush3.msra.mxu0 %v3691_v2 }
0x1311   :  { %3251 = vmatprep.subr.mxu0 %v3464_v18 }
0x1312   :  { %3252 = vmatpush3.msra.mxu0 %v3698_v3 }
0x1313   :  { %3267 = vmatprep.subr.mxu0 %v3464_v18 }
0x13cb   :  { %v1644_v10 = vpop.f32.mrf.mxu0 }
0x13cc   :  { %v1645_v11 = vadd.f32 %v1644_v10, %v1478_v52 }
0x13cd   :  { %v3233_v34 = vpop.f32.mrf.mxu0 }
0x13ce   :  { %v1648_v12 = vadd.f32 %v3660_v40, %v1645_v11  ;;  %v4086_v11 = vld [vmem:[%s4297_s3 + $0x18] sm:$0xff] }
0x13cf   :  { %v4095_v34 = vld [vmem:[%s4298_s4 + $0x18] sm:$0xff] }
0x13d0   :  { %3418 = vtanh.f32 %v1648_v12  ;;  %v4101_v12 = vld [vmem:[%s4297_s3 + $0x10] sm:$0xff] }
0x13dd   :  { %v3419_v13 = vpop.eup %3418 }
0x13de   :  { %1654 = vrot.lane.b32.xlu0 %v3419_v13, %s3462_s1  ;;  %v1650_v14 = vmul.f32 0.5, %v3419_v13  ;;  %v4109_v13 = vld [vmem:[%s4298_s4 + $0x10] sm:$0xff] }
0x13e0   :  { %v1651_v59 = vadd.f32 0.5, %v1650_v14  ;;  %v4115_v14 = vld [vmem:[%s4297_s3 + $0x8] sm:$0xff] }
0x13e2   :  { %v1652_v17 = vmul.f32 %v1651_v59, %v3904_v42 }
0x1450   :  { %v1655_v15 = vpop.permute.xlu0 %1654 }
0x1451   :  { %v1657_v16 = vmul.f32 %v1655_v15, %v1651_v59  ;;  %v4129_v15 = vld [vmem:[%s4297_s3] sm:$0xff] }
0x1453   :  { %1659 = vrot.lane.b32.xlu1 %v1657_v16, %s3463_s25  ;;  %v4138_v16 = vld [vmem:[%s4298_s4] sm:$0xff] }
0x14c5   :  { %v1660_v22 = vpop.permute.xlu1 %1659 }
0x14c6   :  { %v3978_v24 = vadd.f32 %v1660_v22, %v1652_v17 }
0x14c8   :  { %3420 = vtanh.f32 %v3978_v24 }
0x14d5   :  { %v3421_v41 = vpop.eup %3420 }
0x14d6   :  { %1665 = vrot.lane.b32.xlu0 %v3421_v41, %s3462_s1 }
0x1548   :  { %v1666_v42 = vpop.permute.xlu0 %1665 }
0x1549   :  { %v1668_v43 = vmul.f32 %v1666_v42, %v1651_v59  ;;  %v4123_v59 = vld [vmem:[%s4298_s4 + $0x8] sm:$0xff] }
0x154b   :  { %1675 = vrot.lane.b32.xlu1 %v1668_v43, %s3463_s25 }
0x15bd   :  { %v1676_v44 = vpop.permute.xlu1 %1675 }
0x15be   :  { %3243 = vmatmul.mubr.msk.f32.vlgmr.msra.gmra.mxu1 %vm219_vm3, %v1676_v44  ;;  %3254 = vmatmul.mubr.msk.f32.vlgmr.msra.gmra.mxu0 %vm219_vm3, %v1676_v44 }
0x15bf   :  { %3257 = vmatpush3.msra.mxu1 %v3565_v19  ;;  %3264 = vmatprep.mubr.msk.f32.mxu1 %vm3465_vm2, %v3464_v18 }
0x15c0   :  { %3258 = vmatprep.subr.mxu1 %v3464_v18  ;;  %3268 = vmatpush3.msra.mxu0 %v3570_v20 }
0x15c1   :  { %3259 = vmatpush3.msra.mxu1 %v3577_v21  ;;  %3269 = vmatprep.subr.mxu0 %v3464_v18 }
0x15c2   :  { %3260 = vmatprep.subr.mxu1 %v3464_v18  ;;  %3270 = vmatpush3.msra.mxu0 %v3587_v23 }
0x15c3   :  { %3261 = vmatpush3.msra.mxu1 %v3606_v26  ;;  %3271 = vmatprep.subr.mxu0 %v3464_v18  ;;  %v4030_v26 = vld [vmem:[%s4296_s2] ss:$0 sm:$0xff] }
0x15c4   :  { %3262 = vmatprep.subr.mxu1 %v3464_v18  ;;  %3272 = vmatpush3.msra.mxu0 %v3599_v25  ;;  %v177_v31 = vadd.f32 %v4030_v26, %v3655_v39 }
0x15c5   :  { %3263 = vmatpush3.msra.mxu1 %v3625_v29  ;;  %3273 = vmatprep.subr.mxu0 %v3464_v18 }
0x15c6   :  { %3265 = vmatmul.mubr.msk.f32.vlgmr.msra.gmra.mxu1 %vm219_vm3, %v1575_v9  ;;  %3274 = vmatpush3.msra.mxu0 %v3618_v28  ;;  %v172_v28 = vadd.f32 %v4030_v26, %v3649_v36 }
0x15c7   :  { %3275 = vmatprep.mubr.msk.f32.mxu0 %vm3465_vm2, %v3464_v18  ;;  %3278 = vmatprep.subr.mxu1 %v3464_v18 }
0x15c8   :  { %3289 = vmatprep.subr.mxu0 %v3464_v18  ;;  %3286 = vmatprep.mubr.msk.f32.mxu1 %vm3465_vm2, %v3464_v18 }
0x167e   :  { %v1745_v19 = vpop.f32.mrf.mxu1  ;;  %v1816_v20 = vpop.f32.mrf.mxu0 }
0x167f   :  { %v4025_v21 = vadd.f32 %v1745_v19, %v3951_v53 }
0x1680   :  { %v3244_v23 = vpop.f32.mrf.mxu1  ;;  %v3255_v25 = vpop.f32.mrf.mxu0 }
0x1686   :  { %v1886_v29 = vpop.f32.mrf.mxu1 }
0x1687   :  { %v1890_v45 = vadd.f32 %v1886_v29, %v172_v28 }
0x1688   :  { %v3266_v46 = vpop.f32.mrf.mxu1 }
0x1689   :  { %3422 = vtanh.f32 %v1890_v45 }
0x1696   :  { %v3423_v47 = vpop.eup %3422 }
0x1697   :  { %1896 = vrot.lane.b32.xlu0 %v3423_v47, %s3462_s1  ;;  %v1892_v48 = vmul.f32 0.5, %v3423_v47  ;;  %v3457_v47 = vld [vmem:[%s4300_s5 + $0x18] sm:$0xff] }
0x1699   :  { %v1893_v49 = vadd.f32 0.5, %v1892_v48  ;;  %v3458_v48 = vld [vmem:[%s4300_s5 + $0x10] sm:$0xff] }
0x169b   :  { %v1894_v52 = vmul.f32 %v1893_v49, %v3958_v8  ;;  %v2851_v8 = vld [vmem:[%s4301_s7 + $0xa8] sm:$0xff] }
0x1709   :  { %v1897_v50 = vpop.permute.xlu0 %1896 }
0x170a   :  { %v1899_v51 = vmul.f32 %v1897_v50, %v1893_v49  ;;  %v3460_v50 = vld [vmem:[%s4300_s5] sm:$0xff] }
0x170c   :  { %1901 = vrot.lane.b32.xlu1 %v1899_v51, %s3463_s25 }
0x177e   :  { %v1902_v53 = vpop.permute.xlu1 %1901 }
0x177f   :  { %v4037_v35 = vadd.f32 %v1902_v53, %v1894_v52 }
0x1781   :  { %3424 = vtanh.f32 %v4037_v35 }
0x178e   :  { %v3425_v36 = vpop.eup %3424 }
0x178f   :  { %1907 = vrot.lane.b32.xlu0 %v3425_v36, %s3462_s1 }
0x1801   :  { %v1908_v54 = vpop.permute.xlu0 %1907 }
0x1802   :  { %v1910_v55 = vmul.f32 %v1908_v54, %v1893_v49  ;;  %v3459_v49 = vld [vmem:[%s4300_s5 + $0x8] sm:$0xff] }
0x1804   :  { %1912 = vrot.lane.b32.xlu1 %v1910_v55, %s3463_s25 }
0x1876   :  { %v4042_v57 = vpop.permute.xlu1 %1912 }
0x1877   :  { %3276 = vmatmul.mubr.msk.f32.vlgmr.msra.gmra.mxu0 %vm219_vm3, %v4042_v57 }
0x1878   :  { %3290 = vmatpush3.msra.mxu0 %v3679_v0  ;;  %3297 = vmatprep.mubr.msk.f32.mxu0 %vm3465_vm2, %v3464_v18 }
0x1879   :  { %3291 = vmatprep.subr.mxu0 %v3464_v18 }
0x187a   :  { %3292 = vmatpush3.msra.mxu0 %v3684_v1 }
0x187b   :  { %3293 = vmatprep.subr.mxu0 %v3464_v18 }
0x187c   :  { %3294 = vmatpush3.msra.mxu0 %v3691_v2 }
0x187d   :  { %3295 = vmatprep.subr.mxu0 %v3464_v18 }
0x187e   :  { %3296 = vmatpush3.msra.mxu0 %v3698_v3 }
0x187f   :  { %3311 = vmatprep.subr.mxu0 %v3464_v18 }
0x1937   :  { %v1982_v58 = vpop.f32.mrf.mxu0 }
0x1938   :  { %v1983_v60 = vadd.f32 %v1982_v58, %v1816_v20 }
0x1939   :  { %v3277_v0 = vpop.f32.mrf.mxu0 }
0x193a   :  { %v1986_v61 = vadd.f32 %v3660_v40, %v1983_v60  ;;  %v2853_v40 = vld [vmem:[%s4301_s7 + $0xb8] sm:$0xff] }
0x193b   :  { %3279 = vmatpush3.msra.mxu1 %v2853_v40 }
0x193c   :  { %3426 = vtanh.f32 %v1986_v61  ;;  %3280 = vmatprep.subr.mxu1 %v3464_v18 }
0x193d   :  { %3281 = vmatpush3.msra.mxu1 %v2852_v7 }
0x193e   :  { %3282 = vmatprep.subr.mxu1 %v3464_v18 }
0x193f   :  { %3283 = vmatpush3.msra.mxu1 %v2851_v8 }
0x1940   :  { %3284 = vmatprep.subr.mxu1 %v3464_v18 }
0x1941   :  { %3285 = vmatpush3.msra.mxu1 %v2850_v4 }
0x1942   :  { %3300 = vmatprep.subr.mxu1 %v3464_v18 }
0x1949   :  { %v3427_v62 = vpop.eup %3426 }
0x194a   :  { %1992 = vrot.lane.b32.xlu0 %v3427_v62, %s3462_s1  ;;  %v1988_v1 = vmul.f32 0.5, %v3427_v62 }
0x194c   :  { %v1989_v63 = vadd.f32 0.5, %v1988_v1  ;;  %v2861_v1 = vld [vmem:[%s4301_s7 + $0xd8] sm:$0xff] }
0x194e   :  { %v1990_v2 = vmul.f32 %v1989_v63, %v3978_v24 }
0x19bc   :  { %v1993_v5 = vpop.permute.xlu0 %1992 }
0x19bd   :  { %v1995_v6 = vmul.f32 %v1993_v5, %v1989_v63  ;;  %v2859_v5 = vld [vmem:[%s4301_s7 + $0xc8] sm:$0xff] }
0x19bf   :  { %1997 = vrot.lane.b32.xlu1 %v1995_v6, %s3463_s25  ;;  %v2858_v6 = vld [vmem:[%s4301_s7 + $0xc0] sm:$0xff] }
0x1a31   :  { %v1998_v3 = vpop.permute.xlu1 %1997 }
0x1a32   :  { %v4060_v56 = vadd.f32 %v1998_v3, %v1990_v2 }
0x1a34   :  { %3428 = vtanh.f32 %v4060_v56 }
0x1a41   :  { %v3429_v37 = vpop.eup %3428 }
0x1a42   :  { %2003 = vrot.lane.b32.xlu0 %v3429_v37, %s3462_s1 }
0x1ab4   :  { %v2004_v32 = vpop.permute.xlu0 %2003 }
0x1ab5   :  { %v2006_v9 = vmul.f32 %v2004_v32, %v1989_v63  ;;  %v2860_v63 = vld [vmem:[%s4301_s7 + $0xd0] sm:$0xff] }
0x1ab7   :  { %2013 = vrot.lane.b32.xlu1 %v2006_v9, %s3463_s25  ;;  %v182_v9 = vadd.f32 %v4030_v26, %v3653_v38 }
0x1b29   :  { %v2014_v10 = vpop.permute.xlu1 %2013 }
0x1b2a   :  { %3287 = vmatmul.mubr.msk.f32.vlgmr.msra.gmra.mxu1 %vm219_vm3, %v2014_v10  ;;  %3298 = vmatmul.mubr.msk.f32.vlgmr.msra.gmra.mxu0 %vm219_vm3, %v2014_v10 }
0x1b2b   :  { %3301 = vmatpush3.msra.mxu1 %v4086_v11  ;;  %3308 = vmatprep.mubr.msk.f32.mxu1 %vm3465_vm2, %v3464_v18 }
0x1b2c   :  { %3302 = vmatprep.subr.mxu1 %v3464_v18  ;;  %3312 = vmatpush3.msra.mxu0 %v4095_v34 }
0x1b2d   :  { %3303 = vmatpush3.msra.mxu1 %v4101_v12  ;;  %3313 = vmatprep.subr.mxu0 %v3464_v18 }
0x1b2e   :  { %3304 = vmatprep.subr.mxu1 %v3464_v18  ;;  %3314 = vmatpush3.msra.mxu0 %v4109_v13 }
0x1b2f   :  { %3305 = vmatpush3.msra.mxu1 %v4115_v14  ;;  %3315 = vmatprep.subr.mxu0 %v3464_v18 }
0x1b30   :  { %3306 = vmatprep.subr.mxu1 %v3464_v18  ;;  %3316 = vmatpush3.msra.mxu0 %v4123_v59 }
0x1b31   :  { %3307 = vmatpush3.msra.mxu1 %v4129_v15  ;;  %3317 = vmatprep.subr.mxu0 %v3464_v18 }
0x1b32   :  { %3309 = vmatmul.mubr.msk.f32.vlgmr.msra.gmra.mxu1 %vm219_vm3, %v4042_v57  ;;  %3318 = vmatpush3.msra.mxu0 %v4138_v16 }
0x1b33   :  { %3319 = vmatprep.mubr.msk.f32.mxu0 %vm3465_vm2, %v3464_v18  ;;  %3322 = vmatprep.subr.mxu1 %v3464_v18 }
0x1b34   :  { %3333 = vmatprep.subr.mxu0 %v3464_v18  ;;  %3330 = vmatprep.mubr.msk.f32.mxu1 %vm3465_vm2, %v3464_v18 }
0x1b35   :  { %3323 = vmatpush3.msra.mxu1 %v2861_v1 }
0x1b36   :  { %3324 = vmatprep.subr.mxu1 %v3464_v18 }
0x1b37   :  { %3325 = vmatpush3.msra.mxu1 %v2860_v63 }
0x1b38   :  { %3326 = vmatprep.subr.mxu1 %v3464_v18 }
0x1b39   :  { %3327 = vmatpush3.msra.mxu1 %v2859_v5 }
0x1b3a   :  { %3328 = vmatprep.subr.mxu1 %v3464_v18 }
0x1b3b   :  { %3329 = vmatpush3.msra.mxu1 %v2858_v6 }
0x1b3c   :  { %3344 = vmatprep.subr.mxu1 %v3464_v18 }
0x1bea   :  { %v2083_v17 = vpop.f32.mrf.mxu1  ;;  %v2154_v22 = vpop.f32.mrf.mxu0 }
0x1beb   :  { %v4148_v24 = vadd.f32 %v2083_v17, %v4025_v21 }
0x1bec   :  { %v3288_v27 = vpop.f32.mrf.mxu1  ;;  %v3299_v30 = vpop.f32.mrf.mxu0 }
0x1bf2   :  { %v2224_v33 = vpop.f32.mrf.mxu1 }
0x1bf3   :  { %v2228_v41 = vadd.f32 %v2224_v33, %v177_v31 }
0x1bf4   :  { %v3310_v42 = vpop.f32.mrf.mxu1 }
0x1bf5   :  { %3430 = vtanh.f32 %v2228_v41 }
0x1c02   :  { %v3431_v43 = vpop.eup %3430 }
0x1c03   :  { %2234 = vrot.lane.b32.xlu0 %v3431_v43, %s3462_s1  ;;  %v2230_v44 = vmul.f32 0.5, %v3431_v43 }
0x1c05   :  { %v2231_v19 = vadd.f32 0.5, %v2230_v44 }
0x1c07   :  { %v2232_v21 = vmul.f32 %v2231_v19, %v4037_v35  ;;  %v4185_v35 = vld [vmem:[%s4299_s6] ss:$0 sm:$0xff] }
0x1c75   :  { %v2235_v20 = vpop.permute.xlu0 %2234 }
0x1c76   :  { %v2237_v23 = vmul.f32 %v2235_v20, %v2231_v19 }
0x1c78   :  { %2239 = vrot.lane.b32.xlu1 %v2237_v23, %s3463_s25 }
0x1cea   :  { %v2240_v25 = vpop.permute.xlu1 %2239 }
0x1ceb   :  { %v4155_v28 = vadd.f32 %v2240_v25, %v2232_v21 }
0x1ced   :  { %3432 = vtanh.f32 %v4155_v28 }
0x1cfa   :  { %v3433_v39 = vpop.eup %3432 }
0x1cfb   :  { %2245 = vrot.lane.b32.xlu0 %v3433_v39, %s3462_s1  ;;  %v2868_v39 = vld [vmem:[%s4301_s7 + $0xf0] sm:$0xff] }
0x1d6d   :  { %v2246_v29 = vpop.permute.xlu0 %2245 }
0x1d6e   :  { %v2248_v45 = vmul.f32 %v2246_v29, %v2231_v19  ;;  %v2867_v29 = vld [vmem:[%s4301_s7 + $0xe8] sm:$0xff] }
0x1d70   :  { %2250 = vrot.lane.b32.xlu1 %v2248_v45, %s3463_s25  ;;  %v2866_v45 = vld [vmem:[%s4301_s7 + $0xe0] sm:$0xff] }
0x1de2   :  { %v4160_v46 = vpop.permute.xlu1 %2250 }
0x1de3   :  { %3320 = vmatmul.mubr.msk.f32.vlgmr.msra.gmra.mxu0 %vm219_vm3, %v4160_v46 }
0x1de4   :  { %3334 = vmatpush3.msra.mxu0 %v3457_v47  ;;  %3341 = vmatprep.mubr.msk.f32.mxu0 %vm3465_vm2, %v3464_v18 }
0x1de5   :  { %3335 = vmatprep.subr.mxu0 %v3464_v18 }
0x1de6   :  { %3336 = vmatpush3.msra.mxu0 %v3458_v48 }
0x1de7   :  { %3337 = vmatprep.subr.mxu0 %v3464_v18 }
0x1de8   :  { %3338 = vmatpush3.msra.mxu0 %v3459_v49 }
0x1de9   :  { %3339 = vmatprep.subr.mxu0 %v3464_v18 }
0x1dea   :  { %3340 = vmatpush3.msra.mxu0 %v3460_v50 }
0x1deb   :  { %3355 = vmatprep.subr.mxu0 %v3464_v18 }
0x1ea3   :  { %v2320_v51 = vpop.f32.mrf.mxu0 }
0x1ea4   :  { %v2321_v52 = vadd.f32 %v2320_v51, %v2154_v22 }
0x1ea5   :  { %v3321_v53 = vpop.f32.mrf.mxu0 }
0x1ea6   :  { %v2324_v36 = vadd.f32 %v4185_v35, %v2321_v52  ;;  %v2871_v52 = vld [vmem:[%s4304_s8] ss:$0 sm:$0xff] }
0x1ea8   :  { %3434 = vtanh.f32 %v2324_v36 }
0x1eb5   :  { %v3435_v54 = vpop.eup %3434 }
0x1eb6   :  { %2330 = vrot.lane.b32.xlu0 %v3435_v54, %s3462_s1  ;;  %v2326_v55 = vmul.f32 0.5, %v3435_v54 }
0x1eb8   :  { %v2327_v57 = vadd.f32 0.5, %v2326_v55 }
0x1eba   :  { %v2328_v0 = vmul.f32 %v2327_v57, %v4060_v56 }
0x1f28   :  { %v2331_v58 = vpop.permute.xlu0 %2330 }
0x1f29   :  { %v2333_v60 = vmul.f32 %v2331_v58, %v2327_v57 }
0x1f2b   :  { %2335 = vrot.lane.b32.xlu1 %v2333_v60, %s3463_s25 }
0x1f9d   :  { %v2336_v61 = vpop.permute.xlu1 %2335 }
0x1f9e   :  { %v4191_v62 = vadd.f32 %v2336_v61, %v2328_v0 }
0x1fa0   :  { %3436 = vtanh.f32 %v4191_v62 }
0x1fad   :  { %v3437_v2 = vpop.eup %3436 }
0x1fae   :  { %2341 = vrot.lane.b32.xlu0 %v3437_v2, %s3462_s1 }
0x2020   :  { %v2342_v3 = vpop.permute.xlu0 %2341 }
0x2021   :  { %v2344_v56 = vmul.f32 %v2342_v3, %v2327_v57 }
0x2023   :  { %2351 = vrot.lane.b32.xlu1 %v2344_v56, %s3463_s25 }
0x2095   :  { %v2352_v40 = vpop.permute.xlu1 %2351 }
0x2096   :  { %3331 = vmatmul.mubr.msk.f32.vlgmr.msra.gmra.mxu1 %vm219_vm3, %v2352_v40  ;;  %3342 = vmatmul.mubr.msk.f32.vlgmr.msra.gmra.mxu0 %vm219_vm3, %v2352_v40 }
0x2097   :  { %3345 = vmatpush3.msra.mxu1 %v4086_v11  ;;  %3352 = vmatprep.mubr.msk.f32.mxu1 %vm3465_vm2, %v3464_v18 }
0x2098   :  { %3346 = vmatprep.subr.mxu1 %v3464_v18  ;;  %3356 = vmatpush3.msra.mxu0 %v4095_v34 }
0x2099   :  { %3347 = vmatpush3.msra.mxu1 %v4101_v12  ;;  %3357 = vmatprep.subr.mxu0 %v3464_v18 }
0x209a   :  { %3348 = vmatprep.subr.mxu1 %v3464_v18  ;;  %3358 = vmatpush3.msra.mxu0 %v4109_v13 }
0x209b   :  { %3349 = vmatpush3.msra.mxu1 %v4115_v14  ;;  %3359 = vmatprep.subr.mxu0 %v3464_v18 }
0x209c   :  { %3350 = vmatprep.subr.mxu1 %v3464_v18  ;;  %3360 = vmatpush3.msra.mxu0 %v4123_v59 }
0x209d   :  { %3351 = vmatpush3.msra.mxu1 %v4129_v15  ;;  %3361 = vmatprep.subr.mxu0 %v3464_v18 }
0x209e   :  { %3353 = vmatmul.mubr.msk.f32.vlgmr.msra.gmra.mxu1 %vm219_vm3, %v4160_v46  ;;  %3362 = vmatpush3.msra.mxu0 %v4138_v16 }
0x209f   :  { %3363 = vmatprep.mubr.msk.f32.mxu0 %vm3465_vm2, %v3464_v18  ;;  %3366 = vmatprep.subr.mxu1 %v3464_v18 }
0x20a0   :  { %3374 = vmatprep.mubr.msk.f32.mxu1 %vm3465_vm2, %v3464_v18 }
0x2156   :  { %v2421_v7 = vpop.f32.mrf.mxu1  ;;  %v2492_v8 = vpop.f32.mrf.mxu0 }
0x2157   :  { %v4238_v4 = vadd.f32 %v2421_v7, %v4148_v24 }
0x2158   :  { %v3332_v37 = vpop.f32.mrf.mxu1  ;;  %v3343_v32 = vpop.f32.mrf.mxu0 }
0x215e   :  { %v2562_v10 = vpop.f32.mrf.mxu1 }
0x215f   :  { %v2566_v11 = vadd.f32 %v2562_v10, %v182_v9 }
0x2160   :  { %v3354_v34 = vpop.f32.mrf.mxu1 }
0x2161   :  { %3438 = vtanh.f32 %v2566_v11 }
0x216e   :  { %v3439_v12 = vpop.eup %3438 }
0x216f   :  { %2572 = vrot.lane.b32.xlu0 %v3439_v12, %s3462_s1  ;;  %v2568_v13 = vmul.f32 0.5, %v3439_v12 }
0x2171   :  { %v2569_v14 = vadd.f32 0.5, %v2568_v13 }
0x2173   :  { %v2570_v16 = vmul.f32 %v2569_v14, %v4155_v28  ;;  %v2869_v28 = vld [vmem:[%s4301_s7 + $0xf8] sm:$0xff] }
0x2174   :  { %3367 = vmatpush3.msra.mxu1 %v2869_v28 }
0x2175   :  { %3368 = vmatprep.subr.mxu1 %v3464_v18 }
0x2176   :  { %3369 = vmatpush3.msra.mxu1 %v2868_v39 }
0x2177   :  { %3370 = vmatprep.subr.mxu1 %v3464_v18 }
0x2178   :  { %3371 = vmatpush3.msra.mxu1 %v2867_v29 }
0x2179   :  { %3372 = vmatprep.subr.mxu1 %v3464_v18 }
0x217a   :  { %3373 = vmatpush3.msra.mxu1 %v2866_v45 }
0x21e1   :  { %v2573_v59 = vpop.permute.xlu0 %2572 }
0x21e2   :  { %v2575_v15 = vmul.f32 %v2573_v59, %v2569_v14 }
0x21e4   :  { %2577 = vrot.lane.b32.xlu1 %v2575_v15, %s3463_s25 }
0x2256   :  { %v2578_v17 = vpop.permute.xlu1 %2577 }
0x2257   :  { %v2580_v22 = vadd.f32 %v2578_v17, %v2570_v16 }
0x2259   :  { %3440 = vtanh.f32 %v2580_v22 }
0x2266   :  { %v3441_v24 = vpop.eup %3440 }
0x2267   :  { %2583 = vrot.lane.b32.xlu0 %v3441_v24, %s3462_s1 }
0x22d9   :  { %v2584_v38 = vpop.permute.xlu0 %2583 }
0x22da   :  { %v2586_v26 = vmul.f32 %v2584_v38, %v2569_v14 }
0x22dc   :  { %2588 = vrot.lane.b32.xlu1 %v2586_v26, %s3463_s25 }
0x234e   :  { %v2589_v27 = vpop.permute.xlu1 %2588 }
0x234f   :  { %2775 = vst.msk [vmem:[%s4302_s10] sm:$0xff] %vm219_vm3, %v2589_v27  ;;  %3364 = vmatmul.mubr.msk.f32.vlgmr.msra.gmra.mxu0 %vm219_vm3, %v2589_v27 }
0x240f   :  { %v2658_v30 = vpop.f32.mrf.mxu0 }
0x2410   :  { %v2659_v31 = vadd.f32 %v2658_v30, %v2492_v8 }
0x2411   :  { %v3365_v33 = vpop.f32.mrf.mxu0 }
0x2412   :  { %v2662_v41 = vadd.f32 %v4185_v35, %v2659_v31 }
0x2414   :  { %3442 = vtanh.f32 %v2662_v41 }
0x2421   :  { %v3443_v42 = vpop.eup %3442 }
0x2422   :  { %2668 = vrot.lane.b32.xlu0 %v3443_v42, %s3462_s1  ;;  %v2664_v43 = vmul.f32 0.5, %v3443_v42 }
0x2424   :  { %v2665_v44 = vadd.f32 0.5, %v2664_v43 }
0x2426   :  { %v2666_v23 = vmul.f32 %v2665_v44, %v4191_v62 }
0x2494   :  { %v2669_v19 = vpop.permute.xlu0 %2668 }
0x2495   :  { %v2671_v20 = vmul.f32 %v2669_v19, %v2665_v44 }
0x2497   :  { %2673 = vrot.lane.b32.xlu1 %v2671_v20, %s3463_s25 }
0x2509   :  { %v2674_v21 = vpop.permute.xlu1 %2673 }
0x250a   :  { %v2676_v25 = vadd.f32 %v2674_v21, %v2666_v23 }
0x250c   :  { %3444 = vtanh.f32 %v2676_v25 }
0x2519   :  { %v3445_v46 = vpop.eup %3444 }
0x251a   :  { %2679 = vrot.lane.b32.xlu0 %v3445_v46, %s3462_s1 }
0x251e   :  { %2780 = vrot.lane.b32.xlu0 %v2580_v22, %s3466_s0 }
0x258c   :  { %v2680_v47 = vpop.permute.xlu0 %2679 }
0x258d   :  { %v2682_v48 = vmul.f32 %v2680_v47, %v2665_v44 }
0x258f   :  { %2689 = vrot.lane.b32.xlu1 %v2682_v48, %s3463_s25 }
0x2590   :  { %v2781_v49 = vpop.permute.xlu0 %2780 }
0x2591   :  { %2783 = vst.msk [vmem:[%s4303_s11] sm:$0xff] %vm219_vm3, %v2781_v49 }
0x2593   :  { %2785 = vrot.lane.b32.xlu1 %v2676_v25, %s3466_s0 }
0x2601   :  { %v2690_v50 = vpop.permute.xlu1 %2689 }
0x2602   :  { %2872 = vst.msk [vmem:[%s4302_s10 + $0x8] sm:$0xff] %vm219_vm3, %v2690_v50  ;;  %3375 = vmatmul.mubr.msk.f32.vlgmr.msra.gmra.mxu1 %vm219_vm3, %v2690_v50 }
0x2605   :  { %v2786_v18 = vpop.permute.xlu1 %2785 }
0x2606   :  { %2873 = vst.msk [vmem:[%s4303_s11 + $0x8] sm:$0xff] %vm219_vm3, %v2786_v18 }
0x26c2   :  { %v2759_v51 = vpop.f32.mrf.mxu1 }
0x26c3   :  { %v2763_v53 = vadd.f32 %v2759_v51, %v4238_v4 }
0x26c4   :  { %v3376_v35 = vpop.f32.mrf.mxu1 }
0x26c5   :  { %v2771_v36 = vadd.f32 %v2871_v52, %v2763_v53 }
0x26c7   :  { %3446 = vtanh.f32 %v2771_v36 }
0x26d4   :  { %v3447_v54 = vpop.eup %3446 }
0x26d5   :  { %2773 = vst.msk [vmem:[%s4305_s9] sm:$0xff] %vm51_vm1, %v3447_v54 }

</bundles_post_ra>
